<compile_context>
chip_gen: v7x
topology: tpu7x:2x2x1
jax: 0.10.0
libtpu: 0.0.40
codegen_flags: <defaults>
</compile_context>

<pallas_src>
from functools import partial

import jax
import jax.numpy as jnp
from jax.experimental import pallas as pl
from jax.experimental.pallas import tpu as pltpu

LANE = 128  # TPU lane width; out-channel tiles are multiples of this.


# ---------------------------------------------------------------------------
# Pallas kernel bodies
# ---------------------------------------------------------------------------
def _accum_conv(x_ref, w_ref, *, k, stride, Ho, Wo):
    """Accumulate the k*k conv taps as MXU matmuls; returns (Ho*Wo, tn) f32.

    x_ref: (num_phases, Hz, Wz, Cin) stride-phase decomposed padded input for
           one image.  Tap (kh, kw) lives in phase (kh%stride, kw%stride) at
           element offset (kh//stride, kw//stride) -> static slices only.
    w_ref: (k*k, Cin, tn) weights with BN scale folded in.
    """
    cin = x_ref.shape[-1]
    na = min(stride, k)  # number of stride phases actually present per axis
    acc = None
    for kh in range(k):
        for kw in range(k):
            ph = (kh % stride) * na + (kw % stride)
            dh, dw = kh // stride, kw // stride
            x = x_ref[ph, dh:dh + Ho, dw:dw + Wo, :]            # (Ho, Wo, Cin)
            y = jnp.dot(x.reshape(Ho * Wo, cin), w_ref[kh * k + kw],
                        preferred_element_type=jnp.float32)     # MXU, f32 acc
            acc = y if acc is None else acc + y
    return acc


def _convbn_kernel(x_ref, w_ref, b_ref, o_ref, *, k, stride, Ho, Wo, relu):
    """out = maybe_relu(conv(x) + bias)  (BN folded into w/bias)."""
    y = _accum_conv(x_ref, w_ref, k=k, stride=stride, Ho=Ho, Wo=Wo) + b_ref[...]
    if relu:
        y = jnp.maximum(y, 0.0)
    o_ref[...] = y.reshape(o_ref.shape).astype(o_ref.dtype)


def _convbn_res_kernel(x_ref, w_ref, b_ref, r_ref, o_ref, *, k, stride, Ho, Wo):
    """out = relu(conv(x) + bias + residual)   (identity-shortcut path)."""
    y = _accum_conv(x_ref, w_ref, k=k, stride=stride, Ho=Ho, Wo=Wo) + b_ref[...]
    y = y + r_ref[...].reshape(Ho * Wo, -1).astype(jnp.float32)
    o_ref[...] = jnp.maximum(y, 0.0).reshape(o_ref.shape).astype(o_ref.dtype)


def _dual_convbn_kernel(xa_ref, wa_ref, ba_ref, xb_ref, wb_ref, bb_ref, o_ref,
                        *, ka, sa, kb, sb, Ho, Wo):
    """out = relu(convA(xa) + biasA + convB(xb) + biasB).

    Fuses the 3x3 conv_bn2 (branch A) with the 1x1 projection shortcut
    (branch B) into a single kernel so the residual never hits HBM.
    """
    ya = _accum_conv(xa_ref, wa_ref, k=ka, stride=sa, Ho=Ho, Wo=Wo)
    yb = _accum_conv(xb_ref, wb_ref, k=kb, stride=sb, Ho=Ho, Wo=Wo)
    y = ya + ba_ref[...] + yb + bb_ref[...]
    o_ref[...] = jnp.maximum(y, 0.0).reshape(o_ref.shape).astype(o_ref.dtype)


# ---------------------------------------------------------------------------
# Wrapper-side data prep (cheap, no im2col)
# ---------------------------------------------------------------------------
def _round_up(v, m):
    return (v + m - 1) // m * m


def _pad_channels(x, c_pad):
    c = x.shape[-1]
    if c == c_pad:
        return x
    return jnp.pad(x, [(0, 0)] * (x.ndim - 1) + [(0, c_pad - c)])


def _conv_phases(x_nhwc, k, pad, stride):
    """Stride-phase decomposition of the (spatially padded) NHWC input.

    Returns (N * na * na, Hz, Wz, C): phase (a, b) of image n sits at row
    n*na*na + a*na + b; tap (kh, kw) reads phase (kh%stride, kw%stride) at
    element offset (kh//stride, kw//stride).  For stride == 1 this is just the
    padded input (single phase, no extra copy)."""
    N, H, W, C = x_nhwc.shape
    Ho = (H + 2 * pad - k) // stride + 1
    Wo = (W + 2 * pad - k) // stride + 1
    Hz = Ho + (k - 1) // stride
    Wz = Wo + (k - 1) // stride
    xp = x_nhwc if pad == 0 else jnp.pad(
        x_nhwc, ((0, 0), (pad, pad), (pad, pad), (0, 0)))
    na = min(stride, k)
    phases = []
    for a in range(na):
        for b in range(na):
            p = xp[:, a::stride, b::stride, :][:, :Hz, :Wz, :]
            if p.shape[1] != Hz or p.shape[2] != Wz:
                p = jnp.pad(p, ((0, 0), (0, Hz - p.shape[1]),
                                (0, Wz - p.shape[2]), (0, 0)))
            phases.append(p)
    xph = jnp.stack(phases, axis=1).reshape(N * na * na, Hz, Wz, C)
    return xph, Ho, Wo


def _prep_wb(w_oihw, scale, bias, c_pad):
    """Fold BN scale into the conv weights -> (k*k, Cin, Cout_pad), bias (1, Cout_pad)."""
    cout, cin, k, _ = w_oihw.shape
    wm = jnp.transpose(w_oihw, (2, 3, 1, 0)).reshape(k * k, cin, cout)
    wm = wm * scale.reshape(1, 1, cout)
    wm = _pad_channels(wm, c_pad)
    b = _pad_channels(bias.reshape(1, cout).astype(jnp.float32), c_pad)
    return wm, b


# ---------------------------------------------------------------------------
# Fused ConvBn2d (+ residual / fused projection shortcut) (+ ReLU)
# ---------------------------------------------------------------------------
def fused_conv_bn(x_nhwc, w, scale, bias, *, stride, pad, relu=True,
                  residual=None, shortcut=None, out_dtype=None):
    """One fused ConvBn2d pallas_call.  All tensors NHWC.

    residual:  optional NHWC tensor added before the final ReLU (identity path).
    shortcut:  optional dict(x, w, scale, bias, stride) -> 1x1 ConvBn2d
               projection computed in the same kernel and added before ReLU.
    Returns NHWC output whose channel dim is padded to a multiple of 128
    (lane-dense stores); the caller slices off the padding at block exit.
    """
    N, H, W, Cin = x_nhwc.shape
    Cout, _, k, _ = w.shape
    out_dtype = out_dtype or x_nhwc.dtype

    cp = _round_up(max(Cout, LANE), LANE)      # lane-dense out channels
    # Out-channel tile: 256 keeps the 256-wide MXU (v6e/v7x) full when it
    # divides; 128 otherwise (also the natural width for v5e's 128x128 MXUs).
    tn = 256 if cp % 256 == 0 else 128

    xph, Ho, Wo = _conv_phases(x_nhwc, k, pad, stride)
    wm, bm = _prep_wb(w, scale, bias, cp)
    wm = wm.astype(x_nhwc.dtype)               # matmul operand dtype = input dtype
    s2 = min(stride, k) ** 2
    Hz, Wz = xph.shape[1], xph.shape[2]

    grid = (N, cp // tn)
    in_specs = [
        # Full padded spatial extent of one image (all phases) -> stays
        # resident in VMEM across all out-channel tiles and taps.
        pl.BlockSpec((s2, Hz, Wz, Cin), lambda n, j: (n, 0, 0, 0)),
        pl.BlockSpec((k * k, Cin, tn), lambda n, j: (0, 0, j)),
        pl.BlockSpec((1, tn), lambda n, j: (0, j)),
    ]
    args = [xph, wm, bm]
    out_spec = pl.BlockSpec((1, Ho, Wo, tn), lambda n, j: (n, 0, 0, j))
    out_shape = jax.ShapeDtypeStruct((N, Ho, Wo, cp), out_dtype)
    flops = 2 * N * Ho * Wo * (k * k * Cin) * cp

    if shortcut is not None:
        sx, sw = shortcut["x"], shortcut["w"]
        s_stride, sk, s_cin = shortcut["stride"], sw.shape[2], sx.shape[-1]
        sph, Ho2, Wo2 = _conv_phases(sx, sk, 0, s_stride)
        assert (Ho2, Wo2) == (Ho, Wo), "shortcut output size mismatch"
        swm, sbm = _prep_wb(sw, shortcut["scale"], shortcut["bias"], cp)
        swm = swm.astype(sx.dtype)
        s_s2 = min(s_stride, sk) ** 2
        sHz, sWz = sph.shape[1], sph.shape[2]
        in_specs += [
            pl.BlockSpec((s_s2, sHz, sWz, s_cin), lambda n, j: (n, 0, 0, 0)),
            pl.BlockSpec((sk * sk, s_cin, tn), lambda n, j: (0, 0, j)),
            pl.BlockSpec((1, tn), lambda n, j: (0, j)),
        ]
        args += [sph, swm, sbm]
        kernel = partial(_dual_convbn_kernel, ka=k, sa=stride, kb=sk,
                         sb=s_stride, Ho=Ho, Wo=Wo)
        flops += 2 * N * Ho * Wo * (sk * sk * s_cin) * cp
    elif residual is not None:
        assert residual.shape[1:3] == (Ho, Wo), "residual spatial mismatch"
        args.append(_pad_channels(residual, cp))
        in_specs.append(pl.BlockSpec((1, Ho, Wo, tn), lambda n, j: (n, 0, 0, j)))
        kernel = partial(_convbn_res_kernel, k=k, stride=stride, Ho=Ho, Wo=Wo)
    else:
        kernel = partial(_convbn_kernel, k=k, stride=stride, Ho=Ho, Wo=Wo,
                         relu=relu)

    bytes_accessed = sum(int(a.size) * a.dtype.itemsize for a in args)
    bytes_accessed += N * Ho * Wo * cp * jnp.dtype(out_dtype).itemsize

    return pl.pallas_call(
        kernel,
        out_shape=out_shape,
        grid=grid,
        in_specs=in_specs,
        out_specs=out_spec,
        compiler_params=pltpu.CompilerParams(
            # Both grid axes are independent output tiles -> shard across the
            # two TensorCores on v7x / megacore.  (For very large spatial
            # extents on v5e/v6e, vmem_limit_bytes can additionally be raised.)
            dimension_semantics=("parallel", "parallel")),
        cost_estimate=pl.CostEstimate(flops=int(flops), transcendentals=0,
                                      bytes_accessed=int(bytes_accessed)),
    )(*args)


# ---------------------------------------------------------------------------
# BasicBlock forward
# ---------------------------------------------------------------------------
def basic_block(x_nchw, params, *, stride, is_shortcut):
    """Forward pass of BasicBlock (eval-mode BatchNorm), NCHW in / NCHW out."""
    s1, b1 = _fold_bn(params["conv_bn1"])
    s2, b2 = _fold_bn(params["conv_bn2"])
    w1, w2 = params["conv_bn1"]["w"], params["conv_bn2"]["w"]
    out_channel = w2.shape[0]

    # NCHW -> NHWC once at entry; NHWC -> NCHW once at exit.
    x_nhwc = jnp.transpose(x_nchw, (0, 2, 3, 1))

    # conv_bn1 + ReLU.  Its output channels come back zero-padded to a
    # multiple of 128 (lane dense); instead of slicing (an extra HBM pass) we
    # pad conv_bn2's input-channel dim with zero weights so the padding flows
    # through for free.
    z = fused_conv_bn(x_nhwc, w1, s1, b1, stride=stride, pad=1, relu=True)
    w2p = jnp.pad(w2, ((0, 0), (0, z.shape[-1] - w2.shape[1]), (0, 0), (0, 0)))

    if is_shortcut:
        ss, bs = _fold_bn(params["shortcut"])
        out = fused_conv_bn(
            z, w2p, s2, b2, stride=1, pad=1, relu=True,
            shortcut=dict(x=x_nhwc, w=params["shortcut"]["w"],
                          scale=ss, bias=bs, stride=stride))
    else:
        if stride != 1 or x_nhwc.shape[-1] != out_channel:
            raise ValueError("identity shortcut requires stride == 1 and "
                             "in_channel == out_channel")
        out = fused_conv_bn(z, w2p, s2, b2, stride=1, pad=1, relu=True,
                            residual=x_nhwc)

    out = out[..., :out_channel]                 # drop lane padding
    return jnp.transpose(out, (0, 3, 1, 2))      # NHWC -> NCHW


# ---------------------------------------------------------------------------
# Parameter init / BN folding (matches nn.Conv2d / nn.BatchNorm2d shapes)
# ---------------------------------------------------------------------------
def _init_convbn(key, cin, cout, k):
    k1, k2, k3, k4, k5 = jax.random.split(key, 5)
    return dict(
        w=jax.random.normal(k1, (cout, cin, k, k), jnp.float32) * 0.1,
        gamma=1.0 + 0.1 * jax.random.normal(k2, (cout,), jnp.float32),
        beta=0.1 * jax.random.normal(k3, (cout,), jnp.float32),
        mean=0.1 * jax.random.normal(k4, (cout,), jnp.float32),
        var=jnp.abs(jax.random.normal(k5, (cout,), jnp.float32)) + 0.5,
    )


def _fold_bn(p, eps=1e-5):
    scale = p["gamma"] / jnp.sqrt(p["var"] + eps)
    bias = p["beta"] - p["mean"] * scale
    return scale, bias


def init_basic_block(key, in_channel, channel, out_channel, is_shortcut):
    k1, k2, k3 = jax.random.split(key, 3)
    params = dict(
        conv_bn1=_init_convbn(k1, in_channel, channel, 3),
        conv_bn2=_init_convbn(k2, channel, out_channel, 3),
    )
    if is_shortcut:
        params["shortcut"] = _init_convbn(k3, in_channel, out_channel, 1)
    return params


# ---------------------------------------------------------------------------
# Pure-JAX reference (sanity check)
# ---------------------------------------------------------------------------
def _ref_convbn(x, w, scale, bias, stride, pad):
    y = jax.lax.conv_general_dilated(
        x, w, (stride, stride), [(pad, pad), (pad, pad)],
        dimension_numbers=("NCHW", "OIHW", "NCHW"))
    return y * scale[None, :, None, None] + bias[None, :, None, None]


def _ref_basic_block(x, params, *, stride, is_shortcut):
    s1, b1 = _fold_bn(params["conv_bn1"])
    s2, b2 = _fold_bn(params["conv_bn2"])
    z = jax.nn.relu(_ref_convbn(x, params["conv_bn1"]["w"], s1, b1, stride, 1))
    z = _ref_convbn(z, params["conv_bn2"]["w"], s2, b2, 1, 1)
    if is_shortcut:
        ss, bs = _fold_bn(params["shortcut"])
        x = _ref_convbn(x, params["shortcut"]["w"], ss, bs, stride, 0)
    return jax.nn.relu(z + x)


# ---------------------------------------------------------------------------
if __name__ == "__main__":
    key = jax.random.PRNGKey(0)
    kx, kp, kx2, kp2 = jax.random.split(key, 4)

    # Case 1: projection shortcut (1x1 ConvBn2d), stride 2.
    N, Cin, H, W = 2, 4, 16, 16
    channel, out_channel, stride = 8, 16, 2
    x = jax.random.normal(kx, (N, Cin, H, W), jnp.float32)
    params = init_basic_block(kp, Cin, channel, out_channel, True)

    fwd = jax.jit(partial(basic_block, stride=stride, is_shortcut=True))
    out = jax.block_until_ready(fwd(x, params))
    ref = jax.block_until_ready(
        _ref_basic_block(x, params, stride=stride, is_shortcut=True))
    assert out.shape == (N, out_channel, H // stride, W // stride), out.shape
    assert jnp.allclose(out, ref, atol=1e-4, rtol=1e-4), "mismatch (shortcut)"

    # Case 2: identity shortcut, stride 1, in_channel == out_channel.
    x2 = jax.random.normal(kx2, (2, 16, 8, 8), jnp.float32)
    params2 = init_basic_block(kp2, 16, 8, 16, False)
    fwd2 = jax.jit(partial(basic_block, stride=1, is_shortcut=False))
    out2 = jax.block_until_ready(fwd2(x2, params2))
    ref2 = jax.block_until_ready(
        _ref_basic_block(x2, params2, stride=1, is_shortcut=False))
    assert out2.shape == (2, 16, 8, 8), out2.shape
    assert jnp.allclose(out2, ref2, atol=1e-4, rtol=1e-4), "mismatch (identity)"

    print("KERNEL_OK")
</pallas_src>

<mosaic_0001>
module attributes {stable_mosaic.version = 11 : i64} {
  func.func @_convbn_kernel(%arg0: i32, %arg1: i32, %arg2: memref<4x9x9x4xf32, #tpu.memory_space<vmem>>, %arg3: memref<9x4x128xf32, #tpu.memory_space<vmem>>, %arg4: memref<1x128xf32, #tpu.memory_space<vmem>>, %arg5: memref<1x8x8x128xf32, #tpu.memory_space<vmem>>) attributes {dimension_semantics = [#tpu.dimension_semantics<parallel>, #tpu.dimension_semantics<parallel>], iteration_bounds = array<i64: 2, 1>, scalar_prefetch = 0 : i64, scratch_operands = 0 : i64, tpu.core_type = #tpu.core_type<tc>, window_params = [{transform_indices = @transform_0, window_bounds = array<i64: 4, 9, 9, 4>}, {transform_indices = @transform_1, window_bounds = array<i64: 9, 4, 128>}, {transform_indices = @transform_2, window_bounds = array<i64: 1, 128>}, {transform_indices = @transform_3, window_bounds = array<i64: 1, 8, 8, 128>}]} {
    %c0 = arith.constant 0 : index
    %c0_0 = arith.constant 0 : index
    %c0_1 = arith.constant 0 : index
    %c0_2 = arith.constant 0 : index
    %0 = vector.load %arg2[%c0, %c0_0, %c0_1, %c0_2] : memref<4x9x9x4xf32, #tpu.memory_space<vmem>>, vector<1x8x8x4xf32>
    %1 = vector.shape_cast %0 : vector<1x8x8x4xf32> to vector<8x8x4xf32>
    %2 = vector.shape_cast %1 : vector<8x8x4xf32> to vector<64x4xf32>
    %c0_3 = arith.constant 0 : index
    %c0_4 = arith.constant 0 : index
    %c0_5 = arith.constant 0 : index
    %3 = vector.load %arg3[%c0_3, %c0_4, %c0_5] : memref<9x4x128xf32, #tpu.memory_space<vmem>>, vector<1x4x128xf32>
    %4 = vector.shape_cast %3 : vector<1x4x128xf32> to vector<4x128xf32>
    %cst = arith.constant dense<0.000000e+00> : vector<64x128xf32>
    %5 = tpu.matmul %2, %4, %cst {dimension_numbers = #tpu.dot_dimension_numbers<[1], [0], [0], [1], [0, 0, 1, 1], [], []>} : vector<64x4xf32>, vector<4x128xf32>, vector<64x128xf32> -> vector<64x128xf32>
    %c1 = arith.constant 1 : index
    %c0_6 = arith.constant 0 : index
    %c0_7 = arith.constant 0 : index
    %c0_8 = arith.constant 0 : index
    %6 = vector.load %arg2[%c1, %c0_6, %c0_7, %c0_8] : memref<4x9x9x4xf32, #tpu.memory_space<vmem>>, vector<1x8x8x4xf32>
    %7 = vector.shape_cast %6 : vector<1x8x8x4xf32> to vector<8x8x4xf32>
    %8 = vector.shape_cast %7 : vector<8x8x4xf32> to vector<64x4xf32>
    %c1_9 = arith.constant 1 : index
    %c0_10 = arith.constant 0 : index
    %c0_11 = arith.constant 0 : index
    %9 = vector.load %arg3[%c1_9, %c0_10, %c0_11] : memref<9x4x128xf32, #tpu.memory_space<vmem>>, vector<1x4x128xf32>
    %10 = vector.shape_cast %9 : vector<1x4x128xf32> to vector<4x128xf32>
    %cst_12 = arith.constant dense<0.000000e+00> : vector<64x128xf32>
    %11 = tpu.matmul %8, %10, %cst_12 {dimension_numbers = #tpu.dot_dimension_numbers<[1], [0], [0], [1], [0, 0, 1, 1], [], []>} : vector<64x4xf32>, vector<4x128xf32>, vector<64x128xf32> -> vector<64x128xf32>
    %12 = arith.addf %5, %11 : vector<64x128xf32>
    %c0_13 = arith.constant 0 : index
    %c0_14 = arith.constant 0 : index
    %c1_15 = arith.constant 1 : index
    %c0_16 = arith.constant 0 : index
    %13 = vector.load %arg2[%c0_13, %c0_14, %c1_15, %c0_16] : memref<4x9x9x4xf32, #tpu.memory_space<vmem>>, vector<1x8x8x4xf32>
    %14 = vector.shape_cast %13 : vector<1x8x8x4xf32> to vector<8x8x4xf32>
    %15 = vector.shape_cast %14 : vector<8x8x4xf32> to vector<64x4xf32>
    %c2 = arith.constant 2 : index
    %c0_17 = arith.constant 0 : index
    %c0_18 = arith.constant 0 : index
    %16 = vector.load %arg3[%c2, %c0_17, %c0_18] : memref<9x4x128xf32, #tpu.memory_space<vmem>>, vector<1x4x128xf32>
    %17 = vector.shape_cast %16 : vector<1x4x128xf32> to vector<4x128xf32>
    %cst_19 = arith.constant dense<0.000000e+00> : vector<64x128xf32>
    %18 = tpu.matmul %15, %17, %cst_19 {dimension_numbers = #tpu.dot_dimension_numbers<[1], [0], [0], [1], [0, 0, 1, 1], [], []>} : vector<64x4xf32>, vector<4x128xf32>, vector<64x128xf32> -> vector<64x128xf32>
    %19 = arith.addf %12, %18 : vector<64x128xf32>
    %c2_20 = arith.constant 2 : index
    %c0_21 = arith.constant 0 : index
    %c0_22 = arith.constant 0 : index
    %c0_23 = arith.constant 0 : index
    %20 = vector.load %arg2[%c2_20, %c0_21, %c0_22, %c0_23] : memref<4x9x9x4xf32, #tpu.memory_space<vmem>>, vector<1x8x8x4xf32>
    %21 = vector.shape_cast %20 : vector<1x8x8x4xf32> to vector<8x8x4xf32>
    %22 = vector.shape_cast %21 : vector<8x8x4xf32> to vector<64x4xf32>
    %c3 = arith.constant 3 : index
    %c0_24 = arith.constant 0 : index
    %c0_25 = arith.constant 0 : index
    %23 = vector.load %arg3[%c3, %c0_24, %c0_25] : memref<9x4x128xf32, #tpu.memory_space<vmem>>, vector<1x4x128xf32>
    %24 = vector.shape_cast %23 : vector<1x4x128xf32> to vector<4x128xf32>
    %cst_26 = arith.constant dense<0.000000e+00> : vector<64x128xf32>
    %25 = tpu.matmul %22, %24, %cst_26 {dimension_numbers = #tpu.dot_dimension_numbers<[1], [0], [0], [1], [0, 0, 1, 1], [], []>} : vector<64x4xf32>, vector<4x128xf32>, vector<64x128xf32> -> vector<64x128xf32>
    %26 = arith.addf %19, %25 : vector<64x128xf32>
    %c3_27 = arith.constant 3 : index
    %c0_28 = arith.constant 0 : index
    %c0_29 = arith.constant 0 : index
    %c0_30 = arith.constant 0 : index
    %27 = vector.load %arg2[%c3_27, %c0_28, %c0_29, %c0_30] : memref<4x9x9x4xf32, #tpu.memory_space<vmem>>, vector<1x8x8x4xf32>
    %28 = vector.shape_cast %27 : vector<1x8x8x4xf32> to vector<8x8x4xf32>
    %29 = vector.shape_cast %28 : vector<8x8x4xf32> to vector<64x4xf32>
    %c4 = arith.constant 4 : index
    %c0_31 = arith.constant 0 : index
    %c0_32 = arith.constant 0 : index
    %30 = vector.load %arg3[%c4, %c0_31, %c0_32] : memref<9x4x128xf32, #tpu.memory_space<vmem>>, vector<1x4x128xf32>
    %31 = vector.shape_cast %30 : vector<1x4x128xf32> to vector<4x128xf32>
    %cst_33 = arith.constant dense<0.000000e+00> : vector<64x128xf32>
    %32 = tpu.matmul %29, %31, %cst_33 {dimension_numbers = #tpu.dot_dimension_numbers<[1], [0], [0], [1], [0, 0, 1, 1], [], []>} : vector<64x4xf32>, vector<4x128xf32>, vector<64x128xf32> -> vector<64x128xf32>
    %33 = arith.addf %26, %32 : vector<64x128xf32>
    %c2_34 = arith.constant 2 : index
    %c0_35 = arith.constant 0 : index
    %c1_36 = arith.constant 1 : index
    %c0_37 = arith.constant 0 : index
    %34 = vector.load %arg2[%c2_34, %c0_35, %c1_36, %c0_37] : memref<4x9x9x4xf32, #tpu.memory_space<vmem>>, vector<1x8x8x4xf32>
    %35 = vector.shape_cast %34 : vector<1x8x8x4xf32> to vector<8x8x4xf32>
    %36 = vector.shape_cast %35 : vector<8x8x4xf32> to vector<64x4xf32>
    %c5 = arith.constant 5 : index
    %c0_38 = arith.constant 0 : index
    %c0_39 = arith.constant 0 : index
    %37 = vector.load %arg3[%c5, %c0_38, %c0_39] : memref<9x4x128xf32, #tpu.memory_space<vmem>>, vector<1x4x128xf32>
    %38 = vector.shape_cast %37 : vector<1x4x128xf32> to vector<4x128xf32>
    %cst_40 = arith.constant dense<0.000000e+00> : vector<64x128xf32>
    %39 = tpu.matmul %36, %38, %cst_40 {dimension_numbers = #tpu.dot_dimension_numbers<[1], [0], [0], [1], [0, 0, 1, 1], [], []>} : vector<64x4xf32>, vector<4x128xf32>, vector<64x128xf32> -> vector<64x128xf32>
    %40 = arith.addf %33, %39 : vector<64x128xf32>
    %c0_41 = arith.constant 0 : index
    %c1_42 = arith.constant 1 : index
    %c0_43 = arith.constant 0 : index
    %c0_44 = arith.constant 0 : index
    %41 = vector.load %arg2[%c0_41, %c1_42, %c0_43, %c0_44] : memref<4x9x9x4xf32, #tpu.memory_space<vmem>>, vector<1x8x8x4xf32>
    %42 = vector.shape_cast %41 : vector<1x8x8x4xf32> to vector<8x8x4xf32>
    %43 = vector.shape_cast %42 : vector<8x8x4xf32> to vector<64x4xf32>
    %c6 = arith.constant 6 : index
    %c0_45 = arith.constant 0 : index
    %c0_46 = arith.constant 0 : index
    %44 = vector.load %arg3[%c6, %c0_45, %c0_46] : memref<9x4x128xf32, #tpu.memory_space<vmem>>, vector<1x4x128xf32>
    %45 = vector.shape_cast %44 : vector<1x4x128xf32> to vector<4x128xf32>
    %cst_47 = arith.constant dense<0.000000e+00> : vector<64x128xf32>
    %46 = tpu.matmul %43, %45, %cst_47 {dimension_numbers = #tpu.dot_dimension_numbers<[1], [0], [0], [1], [0, 0, 1, 1], [], []>} : vector<64x4xf32>, vector<4x128xf32>, vector<64x128xf32> -> vector<64x128xf32>
    %47 = arith.addf %40, %46 : vector<64x128xf32>
    %c1_48 = arith.constant 1 : index
    %c1_49 = arith.constant 1 : index
    %c0_50 = arith.constant 0 : index
    %c0_51 = arith.constant 0 : index
    %48 = vector.load %arg2[%c1_48, %c1_49, %c0_50, %c0_51] : memref<4x9x9x4xf32, #tpu.memory_space<vmem>>, vector<1x8x8x4xf32>
    %49 = vector.shape_cast %48 : vector<1x8x8x4xf32> to vector<8x8x4xf32>
    %50 = vector.shape_cast %49 : vector<8x8x4xf32> to vector<64x4xf32>
    %c7 = arith.constant 7 : index
    %c0_52 = arith.constant 0 : index
    %c0_53 = arith.constant 0 : index
    %51 = vector.load %arg3[%c7, %c0_52, %c0_53] : memref<9x4x128xf32, #tpu.memory_space<vmem>>, vector<1x4x128xf32>
    %52 = vector.shape_cast %51 : vector<1x4x128xf32> to vector<4x128xf32>
    %cst_54 = arith.constant dense<0.000000e+00> : vector<64x128xf32>
    %53 = tpu.matmul %50, %52, %cst_54 {dimension_numbers = #tpu.dot_dimension_numbers<[1], [0], [0], [1], [0, 0, 1, 1], [], []>} : vector<64x4xf32>, vector<4x128xf32>, vector<64x128xf32> -> vector<64x128xf32>
    %54 = arith.addf %47, %53 : vector<64x128xf32>
    %c0_55 = arith.constant 0 : index
    %c1_56 = arith.constant 1 : index
    %c1_57 = arith.constant 1 : index
    %c0_58 = arith.constant 0 : index
    %55 = vector.load %arg2[%c0_55, %c1_56, %c1_57, %c0_58] : memref<4x9x9x4xf32, #tpu.memory_space<vmem>>, vector<1x8x8x4xf32>
    %56 = vector.shape_cast %55 : vector<1x8x8x4xf32> to vector<8x8x4xf32>
    %57 = vector.shape_cast %56 : vector<8x8x4xf32> to vector<64x4xf32>
    %c8 = arith.constant 8 : index
    %c0_59 = arith.constant 0 : index
    %c0_60 = arith.constant 0 : index
    %58 = vector.load %arg3[%c8, %c0_59, %c0_60] : memref<9x4x128xf32, #tpu.memory_space<vmem>>, vector<1x4x128xf32>
    %59 = vector.shape_cast %58 : vector<1x4x128xf32> to vector<4x128xf32>
    %cst_61 = arith.constant dense<0.000000e+00> : vector<64x128xf32>
    %60 = tpu.matmul %57, %59, %cst_61 {dimension_numbers = #tpu.dot_dimension_numbers<[1], [0], [0], [1], [0, 0, 1, 1], [], []>} : vector<64x4xf32>, vector<4x128xf32>, vector<64x128xf32> -> vector<64x128xf32>
    %61 = arith.addf %54, %60 : vector<64x128xf32>
    %c0_62 = arith.constant 0 : index
    %c0_63 = arith.constant 0 : index
    %62 = vector.load %arg4[%c0_62, %c0_63] : memref<1x128xf32, #tpu.memory_space<vmem>>, vector<1x128xf32>
    %63 = vector.broadcast %62 : vector<1x128xf32> to vector<64x128xf32>
    %64 = arith.addf %61, %63 : vector<64x128xf32>
    %cst_64 = arith.constant 0.000000e+00 : f32
    %65 = vector.broadcast %cst_64 : f32 to vector<64x128xf32>
    %66 = arith.maximumf %64, %65 : vector<64x128xf32>
    %67 = vector.shape_cast %66 : vector<64x128xf32> to vector<1x8x8x128xf32>
    %c0_65 = arith.constant 0 : index
    %c0_66 = arith.constant 0 : index
    %c0_67 = arith.constant 0 : index
    %c0_68 = arith.constant 0 : index
    %68 = vector.load %arg5[%c0_65, %c0_66, %c0_67, %c0_68] : memref<1x8x8x128xf32, #tpu.memory_space<vmem>>, vector<1x8x8x128xf32>
    tpu.vector_store %arg5[%c0_65, %c0_66, %c0_67, %c0_68], %67 {strides = array<i32>} : memref<1x8x8x128xf32, #tpu.memory_space<vmem>>, vector<1x8x8x128xf32>,
    return
  }
  func.func @transform_0(%arg0: i32, %arg1: i32) -> (i32, i32, i32, i32) {
    %c0_i32 = arith.constant 0 : i32
    %c0_i32_0 = arith.constant 0 : i32
    %c0_i32_1 = arith.constant 0 : i32
    %c0_i32_2 = arith.constant 0 : i32
    return %arg0, %c0_i32, %c0_i32_0, %c0_i32_1 : i32, i32, i32, i32
  }
  func.func @transform_1(%arg0: i32, %arg1: i32) -> (i32, i32, i32) {
    %c0_i32 = arith.constant 0 : i32
    %c0_i32_0 = arith.constant 0 : i32
    %c0_i32_1 = arith.constant 0 : i32
    return %c0_i32, %c0_i32_0, %arg1 : i32, i32, i32
  }
  func.func @transform_2(%arg0: i32, %arg1: i32) -> (i32, i32) {
    %c0_i32 = arith.constant 0 : i32
    %c0_i32_0 = arith.constant 0 : i32
    return %c0_i32, %arg1 : i32, i32
  }
  func.func @transform_3(%arg0: i32, %arg1: i32) -> (i32, i32, i32, i32) {
    %c0_i32 = arith.constant 0 : i32
    %c0_i32_0 = arith.constant 0 : i32
    %c0_i32_1 = arith.constant 0 : i32
    return %arg0, %c0_i32, %c0_i32_0, %arg1 : i32, i32, i32, i32
  }
}

module attributes {stable_mosaic.version = 11 : i64} {
  func.func @_dual_convbn_kernel(%arg0: i32, %arg1: i32, %arg2: memref<1x10x10x128xf32, #tpu.memory_space<vmem>>, %arg3: memref<9x128x128xf32, #tpu.memory_space<vmem>>, %arg4: memref<1x128xf32, #tpu.memory_space<vmem>>, %arg5: memref<1x8x8x4xf32, #tpu.memory_space<vmem>>, %arg6: memref<1x4x128xf32, #tpu.memory_space<vmem>>, %arg7: memref<1x128xf32, #tpu.memory_space<vmem>>, %arg8: memref<1x8x8x128xf32, #tpu.memory_space<vmem>>) attributes {dimension_semantics = [#tpu.dimension_semantics<parallel>, #tpu.dimension_semantics<parallel>], iteration_bounds = array<i64: 2, 1>, scalar_prefetch = 0 : i64, scratch_operands = 0 : i64, tpu.core_type = #tpu.core_type<tc>, window_params = [{transform_indices = @transform_0, window_bounds = array<i64: 1, 10, 10, 128>}, {transform_indices = @transform_1, window_bounds = array<i64: 9, 128, 128>}, {transform_indices = @transform_2, window_bounds = array<i64: 1, 128>}, {transform_indices = @transform_3, window_bounds = array<i64: 1, 8, 8, 4>}, {transform_indices = @transform_4, window_bounds = array<i64: 1, 4, 128>}, {transform_indices = @transform_5, window_bounds = array<i64: 1, 128>}, {transform_indices = @transform_6, window_bounds = array<i64: 1, 8, 8, 128>}]} {
    %c0 = arith.constant 0 : index
    %c0_0 = arith.constant 0 : index
    %c0_1 = arith.constant 0 : index
    %c0_2 = arith.constant 0 : index
    %0 = vector.load %arg2[%c0, %c0_0, %c0_1, %c0_2] : memref<1x10x10x128xf32, #tpu.memory_space<vmem>>, vector<1x8x8x128xf32>
    %1 = vector.shape_cast %0 : vector<1x8x8x128xf32> to vector<8x8x128xf32>
    %2 = vector.shape_cast %1 : vector<8x8x128xf32> to vector<64x128xf32>
    %c0_3 = arith.constant 0 : index
    %c0_4 = arith.constant 0 : index
    %c0_5 = arith.constant 0 : index
    %3 = vector.load %arg3[%c0_3, %c0_4, %c0_5] : memref<9x128x128xf32, #tpu.memory_space<vmem>>, vector<1x128x128xf32>
    %4 = vector.shape_cast %3 : vector<1x128x128xf32> to vector<128x128xf32>
    %cst = arith.constant dense<0.000000e+00> : vector<64x128xf32>
    %5 = tpu.matmul %2, %4, %cst {dimension_numbers = #tpu.dot_dimension_numbers<[1], [0], [0], [1], [0, 0, 1, 1], [], []>} : vector<64x128xf32>, vector<128x128xf32>, vector<64x128xf32> -> vector<64x128xf32>
    %c0_6 = arith.constant 0 : index
    %c0_7 = arith.constant 0 : index
    %c1 = arith.constant 1 : index
    %c0_8 = arith.constant 0 : index
    %6 = vector.load %arg2[%c0_6, %c0_7, %c1, %c0_8] : memref<1x10x10x128xf32, #tpu.memory_space<vmem>>, vector<1x8x8x128xf32>
    %7 = vector.shape_cast %6 : vector<1x8x8x128xf32> to vector<8x8x128xf32>
    %8 = vector.shape_cast %7 : vector<8x8x128xf32> to vector<64x128xf32>
    %c1_9 = arith.constant 1 : index
    %c0_10 = arith.constant 0 : index
    %c0_11 = arith.constant 0 : index
    %9 = vector.load %arg3[%c1_9, %c0_10, %c0_11] : memref<9x128x128xf32, #tpu.memory_space<vmem>>, vector<1x128x128xf32>
    %10 = vector.shape_cast %9 : vector<1x128x128xf32> to vector<128x128xf32>
    %cst_12 = arith.constant dense<0.000000e+00> : vector<64x128xf32>
    %11 = tpu.matmul %8, %10, %cst_12 {dimension_numbers = #tpu.dot_dimension_numbers<[1], [0], [0], [1], [0, 0, 1, 1], [], []>} : vector<64x128xf32>, vector<128x128xf32>, vector<64x128xf32> -> vector<64x128xf32>
    %12 = arith.addf %5, %11 : vector<64x128xf32>
    %c0_13 = arith.constant 0 : index
    %c0_14 = arith.constant 0 : index
    %c2 = arith.constant 2 : index
    %c0_15 = arith.constant 0 : index
    %13 = vector.load %arg2[%c0_13, %c0_14, %c2, %c0_15] : memref<1x10x10x128xf32, #tpu.memory_space<vmem>>, vector<1x8x8x128xf32>
    %14 = vector.shape_cast %13 : vector<1x8x8x128xf32> to vector<8x8x128xf32>
    %15 = vector.shape_cast %14 : vector<8x8x128xf32> to vector<64x128xf32>
    %c2_16 = arith.constant 2 : index
    %c0_17 = arith.constant 0 : index
    %c0_18 = arith.constant 0 : index
    %16 = vector.load %arg3[%c2_16, %c0_17, %c0_18] : memref<9x128x128xf32, #tpu.memory_space<vmem>>, vector<1x128x128xf32>
    %17 = vector.shape_cast %16 : vector<1x128x128xf32> to vector<128x128xf32>
    %cst_19 = arith.constant dense<0.000000e+00> : vector<64x128xf32>
    %18 = tpu.matmul %15, %17, %cst_19 {dimension_numbers = #tpu.dot_dimension_numbers<[1], [0], [0], [1], [0, 0, 1, 1], [], []>} : vector<64x128xf32>, vector<128x128xf32>, vector<64x128xf32> -> vector<64x128xf32>
    %19 = arith.addf %12, %18 : vector<64x128xf32>
    %c0_20 = arith.constant 0 : index
    %c1_21 = arith.constant 1 : index
    %c0_22 = arith.constant 0 : index
    %c0_23 = arith.constant 0 : index
    %20 = vector.load %arg2[%c0_20, %c1_21, %c0_22, %c0_23] : memref<1x10x10x128xf32, #tpu.memory_space<vmem>>, vector<1x8x8x128xf32>
    %21 = vector.shape_cast %20 : vector<1x8x8x128xf32> to vector<8x8x128xf32>
    %22 = vector.shape_cast %21 : vector<8x8x128xf32> to vector<64x128xf32>
    %c3 = arith.constant 3 : index
    %c0_24 = arith.constant 0 : index
    %c0_25 = arith.constant 0 : index
    %23 = vector.load %arg3[%c3, %c0_24, %c0_25] : memref<9x128x128xf32, #tpu.memory_space<vmem>>, vector<1x128x128xf32>
    %24 = vector.shape_cast %23 : vector<1x128x128xf32> to vector<128x128xf32>
    %cst_26 = arith.constant dense<0.000000e+00> : vector<64x128xf32>
    %25 = tpu.matmul %22, %24, %cst_26 {dimension_numbers = #tpu.dot_dimension_numbers<[1], [0], [0], [1], [0, 0, 1, 1], [], []>} : vector<64x128xf32>, vector<128x128xf32>, vector<64x128xf32> -> vector<64x128xf32>
    %26 = arith.addf %19, %25 : vector<64x128xf32>
    %c0_27 = arith.constant 0 : index
    %c1_28 = arith.constant 1 : index
    %c1_29 = arith.constant 1 : index
    %c0_30 = arith.constant 0 : index
    %27 = vector.load %arg2[%c0_27, %c1_28, %c1_29, %c0_30] : memref<1x10x10x128xf32, #tpu.memory_space<vmem>>, vector<1x8x8x128xf32>
    %28 = vector.shape_cast %27 : vector<1x8x8x128xf32> to vector<8x8x128xf32>
    %29 = vector.shape_cast %28 : vector<8x8x128xf32> to vector<64x128xf32>
    %c4 = arith.constant 4 : index
    %c0_31 = arith.constant 0 : index
    %c0_32 = arith.constant 0 : index
    %30 = vector.load %arg3[%c4, %c0_31, %c0_32] : memref<9x128x128xf32, #tpu.memory_space<vmem>>, vector<1x128x128xf32>
    %31 = vector.shape_cast %30 : vector<1x128x128xf32> to vector<128x128xf32>
    %cst_33 = arith.constant dense<0.000000e+00> : vector<64x128xf32>
    %32 = tpu.matmul %29, %31, %cst_33 {dimension_numbers = #tpu.dot_dimension_numbers<[1], [0], [0], [1], [0, 0, 1, 1], [], []>} : vector<64x128xf32>, vector<128x128xf32>, vector<64x128xf32> -> vector<64x128xf32>
    %33 = arith.addf %26, %32 : vector<64x128xf32>
    %c0_34 = arith.constant 0 : index
    %c1_35 = arith.constant 1 : index
    %c2_36 = arith.constant 2 : index
    %c0_37 = arith.constant 0 : index
    %34 = vector.load %arg2[%c0_34, %c1_35, %c2_36, %c0_37] : memref<1x10x10x128xf32, #tpu.memory_space<vmem>>, vector<1x8x8x128xf32>
    %35 = vector.shape_cast %34 : vector<1x8x8x128xf32> to vector<8x8x128xf32>
    %36 = vector.shape_cast %35 : vector<8x8x128xf32> to vector<64x128xf32>
    %c5 = arith.constant 5 : index
    %c0_38 = arith.constant 0 : index
    %c0_39 = arith.constant 0 : index
    %37 = vector.load %arg3[%c5, %c0_38, %c0_39] : memref<9x128x128xf32, #tpu.memory_space<vmem>>, vector<1x128x128xf32>
    %38 = vector.shape_cast %37 : vector<1x128x128xf32> to vector<128x128xf32>
    %cst_40 = arith.constant dense<0.000000e+00> : vector<64x128xf32>
    %39 = tpu.matmul %36, %38, %cst_40 {dimension_numbers = #tpu.dot_dimension_numbers<[1], [0], [0], [1], [0, 0, 1, 1], [], []>} : vector<64x128xf32>, vector<128x128xf32>, vector<64x128xf32> -> vector<64x128xf32>
    %40 = arith.addf %33, %39 : vector<64x128xf32>
    %c0_41 = arith.constant 0 : index
    %c2_42 = arith.constant 2 : index
    %c0_43 = arith.constant 0 : index
    %c0_44 = arith.constant 0 : index
    %41 = vector.load %arg2[%c0_41, %c2_42, %c0_43, %c0_44] : memref<1x10x10x128xf32, #tpu.memory_space<vmem>>, vector<1x8x8x128xf32>
    %42 = vector.shape_cast %41 : vector<1x8x8x128xf32> to vector<8x8x128xf32>
    %43 = vector.shape_cast %42 : vector<8x8x128xf32> to vector<64x128xf32>
    %c6 = arith.constant 6 : index
    %c0_45 = arith.constant 0 : index
    %c0_46 = arith.constant 0 : index
    %44 = vector.load %arg3[%c6, %c0_45, %c0_46] : memref<9x128x128xf32, #tpu.memory_space<vmem>>, vector<1x128x128xf32>
    %45 = vector.shape_cast %44 : vector<1x128x128xf32> to vector<128x128xf32>
    %cst_47 = arith.constant dense<0.000000e+00> : vector<64x128xf32>
    %46 = tpu.matmul %43, %45, %cst_47 {dimension_numbers = #tpu.dot_dimension_numbers<[1], [0], [0], [1], [0, 0, 1, 1], [], []>} : vector<64x128xf32>, vector<128x128xf32>, vector<64x128xf32> -> vector<64x128xf32>
    %47 = arith.addf %40, %46 : vector<64x128xf32>
    %c0_48 = arith.constant 0 : index
    %c2_49 = arith.constant 2 : index
    %c1_50 = arith.constant 1 : index
    %c0_51 = arith.constant 0 : index
    %48 = vector.load %arg2[%c0_48, %c2_49, %c1_50, %c0_51] : memref<1x10x10x128xf32, #tpu.memory_space<vmem>>, vector<1x8x8x128xf32>
    %49 = vector.shape_cast %48 : vector<1x8x8x128xf32> to vector<8x8x128xf32>
    %50 = vector.shape_cast %49 : vector<8x8x128xf32> to vector<64x128xf32>
    %c7 = arith.constant 7 : index
    %c0_52 = arith.constant 0 : index
    %c0_53 = arith.constant 0 : index
    %51 = vector.load %arg3[%c7, %c0_52, %c0_53] : memref<9x128x128xf32, #tpu.memory_space<vmem>>, vector<1x128x128xf32>
    %52 = vector.shape_cast %51 : vector<1x128x128xf32> to vector<128x128xf32>
    %cst_54 = arith.constant dense<0.000000e+00> : vector<64x128xf32>
    %53 = tpu.matmul %50, %52, %cst_54 {dimension_numbers = #tpu.dot_dimension_numbers<[1], [0], [0], [1], [0, 0, 1, 1], [], []>} : vector<64x128xf32>, vector<128x128xf32>, vector<64x128xf32> -> vector<64x128xf32>
    %54 = arith.addf %47, %53 : vector<64x128xf32>
    %c0_55 = arith.constant 0 : index
    %c2_56 = arith.constant 2 : index
    %c2_57 = arith.constant 2 : index
    %c0_58 = arith.constant 0 : index
    %55 = vector.load %arg2[%c0_55, %c2_56, %c2_57, %c0_58] : memref<1x10x10x128xf32, #tpu.memory_space<vmem>>, vector<1x8x8x128xf32>
    %56 = vector.shape_cast %55 : vector<1x8x8x128xf32> to vector<8x8x128xf32>
    %57 = vector.shape_cast %56 : vector<8x8x128xf32> to vector<64x128xf32>
    %c8 = arith.constant 8 : index
    %c0_59 = arith.constant 0 : index
    %c0_60 = arith.constant 0 : index
    %58 = vector.load %arg3[%c8, %c0_59, %c0_60] : memref<9x128x128xf32, #tpu.memory_space<vmem>>, vector<1x128x128xf32>
    %59 = vector.shape_cast %58 : vector<1x128x128xf32> to vector<128x128xf32>
    %cst_61 = arith.constant dense<0.000000e+00> : vector<64x128xf32>
    %60 = tpu.matmul %57, %59, %cst_61 {dimension_numbers = #tpu.dot_dimension_numbers<[1], [0], [0], [1], [0, 0, 1, 1], [], []>} : vector<64x128xf32>, vector<128x128xf32>, vector<64x128xf32> -> vector<64x128xf32>
    %61 = arith.addf %54, %60 : vector<64x128xf32>
    %c0_62 = arith.constant 0 : index
    %c0_63 = arith.constant 0 : index
    %c0_64 = arith.constant 0 : index
    %c0_65 = arith.constant 0 : index
    %62 = vector.load %arg5[%c0_62, %c0_63, %c0_64, %c0_65] : memref<1x8x8x4xf32, #tpu.memory_space<vmem>>, vector<1x8x8x4xf32>
    %63 = vector.shape_cast %62 : vector<1x8x8x4xf32> to vector<8x8x4xf32>
    %64 = vector.shape_cast %63 : vector<8x8x4xf32> to vector<64x4xf32>
    %c0_66 = arith.constant 0 : index
    %c0_67 = arith.constant 0 : index
    %c0_68 = arith.constant 0 : index
    %65 = vector.load %arg6[%c0_66, %c0_67, %c0_68] : memref<1x4x128xf32, #tpu.memory_space<vmem>>, vector<1x4x128xf32>
    %66 = vector.shape_cast %65 : vector<1x4x128xf32> to vector<4x128xf32>
    %cst_69 = arith.constant dense<0.000000e+00> : vector<64x128xf32>
    %67 = tpu.matmul %64, %66, %cst_69 {dimension_numbers = #tpu.dot_dimension_numbers<[1], [0], [0], [1], [0, 0, 1, 1], [], []>} : vector<64x4xf32>, vector<4x128xf32>, vector<64x128xf32> -> vector<64x128xf32>
    %c0_70 = arith.constant 0 : index
    %c0_71 = arith.constant 0 : index
    %68 = vector.load %arg4[%c0_70, %c0_71] : memref<1x128xf32, #tpu.memory_space<vmem>>, vector<1x128xf32>
    %69 = vector.broadcast %68 : vector<1x128xf32> to vector<64x128xf32>
    %70 = arith.addf %61, %69 : vector<64x128xf32>
    %71 = arith.addf %70, %67 : vector<64x128xf32>
    %c0_72 = arith.constant 0 : index
    %c0_73 = arith.constant 0 : index
    %72 = vector.load %arg7[%c0_72, %c0_73] : memref<1x128xf32, #tpu.memory_space<vmem>>, vector<1x128xf32>
    %73 = vector.broadcast %72 : vector<1x128xf32> to vector<64x128xf32>
    %74 = arith.addf %71, %73 : vector<64x128xf32>
    %cst_74 = arith.constant 0.000000e+00 : f32
    %75 = vector.broadcast %cst_74 : f32 to vector<64x128xf32>
    %76 = arith.maximumf %74, %75 : vector<64x128xf32>
    %77 = vector.shape_cast %76 : vector<64x128xf32> to vector<1x8x8x128xf32>
    %c0_75 = arith.constant 0 : index
    %c0_76 = arith.constant 0 : index
    %c0_77 = arith.constant 0 : index
    %c0_78 = arith.constant 0 : index
    %78 = vector.load %arg8[%c0_75, %c0_76, %c0_77, %c0_78] : memref<1x8x8x128xf32, #tpu.memory_space<vmem>>, vector<1x8x8x128xf32>
    tpu.vector_store %arg8[%c0_75, %c0_76, %c0_77, %c0_78], %77 {strides = array<i32>} : memref<1x8x8x128xf32, #tpu.memory_space<vmem>>, vector<1x8x8x128xf32>,
    return
  }
  func.func @transform_0(%arg0: i32, %arg1: i32) -> (i32, i32, i32, i32) {
    %c0_i32 = arith.constant 0 : i32
    %c0_i32_0 = arith.constant 0 : i32
    %c0_i32_1 = arith.constant 0 : i32
    %c0_i32_2 = arith.constant 0 : i32
    return %arg0, %c0_i32, %c0_i32_0, %c0_i32_1 : i32, i32, i32, i32
  }
  func.func @transform_1(%arg0: i32, %arg1: i32) -> (i32, i32, i32) {
    %c0_i32 = arith.constant 0 : i32
    %c0_i32_0 = arith.constant 0 : i32
    %c0_i32_1 = arith.constant 0 : i32
    return %c0_i32, %c0_i32_0, %arg1 : i32, i32, i32
  }
  func.func @transform_2(%arg0: i32, %arg1: i32) -> (i32, i32) {
    %c0_i32 = arith.constant 0 : i32
    %c0_i32_0 = arith.constant 0 : i32
    return %c0_i32, %arg1 : i32, i32
  }
  func.func @transform_3(%arg0: i32, %arg1: i32) -> (i32, i32, i32, i32) {
    %c0_i32 = arith.constant 0 : i32
    %c0_i32_0 = arith.constant 0 : i32
    %c0_i32_1 = arith.constant 0 : i32
    %c0_i32_2 = arith.constant 0 : i32
    return %arg0, %c0_i32, %c0_i32_0, %c0_i32_1 : i32, i32, i32, i32
  }
  func.func @transform_4(%arg0: i32, %arg1: i32) -> (i32, i32, i32) {
    %c0_i32 = arith.constant 0 : i32
    %c0_i32_0 = arith.constant 0 : i32
    %c0_i32_1 = arith.constant 0 : i32
    return %c0_i32, %c0_i32_0, %arg1 : i32, i32, i32
  }
  func.func @transform_5(%arg0: i32, %arg1: i32) -> (i32, i32) {
    %c0_i32 = arith.constant 0 : i32
    %c0_i32_0 = arith.constant 0 : i32
    return %c0_i32, %arg1 : i32, i32
  }
  func.func @transform_6(%arg0: i32, %arg1: i32) -> (i32, i32, i32, i32) {
    %c0_i32 = arith.constant 0 : i32
    %c0_i32_0 = arith.constant 0 : i32
    %c0_i32_1 = arith.constant 0 : i32
    return %arg0, %c0_i32, %c0_i32_0, %arg1 : i32, i32, i32, i32
  }
}

</mosaic_0001>

<bundles_post_ra>
// kernel: basic_block.2
= control target key start
LH: loop header
LB: loop body
LE: loop exit
PB: predicated region body
PF: predicated region fallthrough
CT: control target
= control target key end

     0   :  { %s2205_s12 = smov 0   ;;  %s2207_s13 = smov 0   ;;  %s2462_s0 = inlined_call_operand.vmem [shape: f32[8,9,9,4], index: 0, kind: input, shape index: {}]   ;;  %s2463_s1 = inlined_call_operand.vmem [shape: f32[9,4,128], index: 1, kind: input, shape index: {}]   ;;  %s2464_s2 = inlined_call_operand.vmem [shape: f32[1,128], index: 2, kind: input, shape index: {}]   ;;  %s2465_s3 = inlined_call_operand.vmem [shape: f32[2,8,8,128], index: 3, kind: output, shape index: {}]  }
   0x1   :  { %s2209_s14 = smov 0  }
   0x2 LB: > { %s25_s15 = sadd.s32 1, %s2179_s13  ;;  %p1709_p0 = scmp.ge.s32.totalorder %s2183_s14, 1  ;;  %s2183_s14 = sphi %s2209_s14, %s13_s14   ;;  %s2179_s13 = sphi %s2207_s13, %s2467_s13   ;;  %s2175_s12 = sphi %s2205_s12, %s2466_s12  }
   0x3   : > { %p27_p1 = scmp.ge.s32.totalorder %s25_s15, 2  ;;  %p170_p2 = scmp.lt.s32.totalorder %s2183_s14, 3 }
   0x5   : > { %s2469_s15 = smov (%p27_p1, %s25_s15), 0  ;;  %p171_p3 = pnand %p1709_p0, %p170_p2 }
   0x6   : > { %v1722_v0 = vld [vmem:[%s2463_s1 + $0x4] sm:$0xf] (!%p171_p3)  ;;  %vm272_vm0 = vcmask (!%p171_p3), 1043456   ;;  %v2231_v1 = vld [vmem:[%s2463_s1 + $0x10] sm:$0xf] (!%p171_p3)  ;;  %s1710_s20 = sshll.u32 (!%p171_p3), %s2175_s12, 2 }
   0x7   : > { %174 = sbr.rel (%p171_p3) target bundleno = 309 (0x135), region = 32  ;;  %1944 = vmatprep.subr.msk.mxu1 (!%p171_p3), %vm272_vm0, %v1722_v0  ;;  %2000 = vmatprep.subr.msk.mxu0 (!%p171_p3), %vm272_vm0, %v2231_v1  ;;  %p206_p4 = scmp.lt.s32.totalorder (!%p171_p3), %s1710_s20, 7  ;;  %v235_v2 = vld [vmem:[%s2463_s1] sm:$0xf] (!%p171_p3)  ;;  %v1795_v3 = vld [vmem:[%s2463_s1 + $0x14] sm:$0xf] (!%p171_p3) }
   0x8   : > { %1945 = vmatpush3.msk.msra.mxu1 (!%p171_p3), %vm272_vm0, %v1722_v0  ;;  %2001 = vmatpush3.msk.msra.mxu0 (!%p171_p3), %vm272_vm0, %v2231_v1  ;;  %vm247_vm1 = vcmask (!%p171_p3), 31744   ;;  %v1813_v10 = vld [vmem:[%s2463_s1 + $0x18] sm:$0xf] (!%p171_p3)  ;;  %v1741_v11 = vld [vmem:[%s2463_s1 + $0x8] sm:$0xf] (!%p171_p3)  ;;  %p219_p5 = scmp.lt.s32.totalorder (!%p171_p3), %s2175_s12, 1 }
   0x9   : > { %1958 = vmatprep.subr.msk.mxu1 (!%p171_p3), %vm272_vm0, %v235_v2  ;;  %2014 = vmatprep.subr.msk.mxu0 (!%p171_p3), %vm272_vm0, %v1795_v3  ;;  %v1831_v20 = vld [vmem:[%s2463_s1 + $0x1c] sm:$0xf] (!%p171_p3)  ;;  %v1759_v29 = vld [vmem:[%s2463_s1 + $0xc] sm:$0xf] (!%p171_p3)  ;;  %v1849_v35 = vld [vmem:[%s2463_s1 + $0x20] sm:$0xf] (!%p171_p3) }
   0xe   : > { %s2471_s20 = smov (!%p206_p4, %s1710_s20), 7  ;;  %s2473_s12 = smov (!%p219_p5, %s2175_s12), 1 }
   0xf   : > { %s2136_s25 = smul.u32 144, %s2471_s20  ;;  %s1862_s18 = sshll.u32 %s2473_s12, 6 }
  0x10   : > { %s2443_s21 = scalar_lea.vmem %s2465_s3, %s1862_s18 }
  0x11   : > { %s2251_s28 = scalar_lea.vmem %s2462_s0, %s2136_s25 }
  0x12   : > { %v1714_v4 = vld [vmem:[%s2251_s28 + $0x90] sm:$0xff]  ;;  %v2256_v6 = vld [vmem:[%s2251_s28 + $0xa0] sm:$0xff] }
  0x13   : > { %v1769_v5 = vld [vmem:[%s2251_s28 + $0x1b0] sm:$0xff]  ;;  %1946 = vmatprep.mubr.msk.f32.mxu1 %vm247_vm1, %v1714_v4  ;;  %v1770_v7 = vld [vmem:[%s2251_s28 + $0x1c0] sm:$0xff] }
  0x14   : > { %2002 = vmatprep.mubr.msk.f32.mxu0 %vm247_vm1, %v1769_v5  ;;  %v2262_v8 = vld [vmem:[%s2251_s28 + $0xb0] sm:$0xff]  ;;  %1947 = vmatmul.mubr.msk.f32.vlgmr.msra.gmra.mrb[0].mxu1 %vm247_vm1, %v2256_v6  ;;  %v2277_v12 = vld [vmem:[%s2251_s28 + $0xc0] sm:$0xff] }
  0x15   : > { %v1771_v9 = vld [vmem:[%s2251_s28 + $0x1d0] sm:$0xff]  ;;  %2003 = vmatmul.mubr.msk.f32.vlgmr.msra.gmra.mrb[0].mxu0 %vm247_vm1, %v1770_v7  ;;  %1959 = vmatpush3.msk.msra.mxu1 %vm272_vm0, %v235_v2  ;;  %v1772_v13 = vld [vmem:[%s2251_s28 + $0x1e0] sm:$0xff] }
  0x16   : > { %2015 = vmatpush3.msk.msra.mxu0 %vm272_vm0, %v1795_v3  ;;  %1949 = vmatprep.mubr.msk.f32.mxu1 %vm247_vm1, %v2262_v8  ;;  %v2284_v14 = vld [vmem:[%s2251_s28 + $0xd0] sm:$0xff]  ;;  %v1787_v15 = vld [vmem:[%s2251_s28 + $0x121] sm:$0xff] }
  0x17   : > { %2005 = vmatprep.mubr.msk.f32.mxu0 %vm247_vm1, %v1771_v9  ;;  %2028 = vmatprep.subr.msk.mxu0 %vm272_vm0, %v1813_v10  ;;  %v2296_v16 = vld [vmem:[%s2251_s28 + $0xe0] sm:$0xff]  ;;  %v1788_v17 = vld [vmem:[%s2251_s28 + $0x131] sm:$0xff] }
  0x18   : > { %1972 = vmatprep.subr.msk.mxu1 %vm272_vm0, %v1741_v11  ;;  %1950 = vmatmul.mubr.msk.f32.gmra.mrb[2].mxu1 %vm247_vm1, %v2277_v12  ;;  %v2300_v18 = vld [vmem:[%s2251_s28 + $0xf0] sm:$0xff]  ;;  %v1789_v19 = vld [vmem:[%s2251_s28 + $0x141] sm:$0xff] }
  0x19   : > { %2006 = vmatmul.mubr.msk.f32.gmra.mrb[2].mxu0 %vm247_vm1, %v1772_v13  ;;  %1952 = vmatprep.mubr.msk.f32.mxu1 %vm247_vm1, %v2284_v14  ;;  %v2313_v21 = vld [vmem:[%s2251_s28 + $0x100] sm:$0xff]  ;;  %v1790_v22 = vld [vmem:[%s2251_s28 + $0x151] sm:$0xff] }
  0x1a   : > { %2016 = vmatprep.mubr.msk.f32.mxu0 %vm247_vm1, %v1787_v15  ;;  %v227_v23 = vld [vmem:[%s2251_s28] sm:$0xff]  ;;  %v228_v25 = vld [vmem:[%s2251_s28 + $0x10] sm:$0xff] }
  0x1b   : > { %v1791_v24 = vld [vmem:[%s2251_s28 + $0x161] sm:$0xff]  ;;  %v1792_v26 = vld [vmem:[%s2251_s28 + $0x171] sm:$0xff] }
  0x1c   : > { %1953 = vmatmul.mubr.msk.f32.gmra.mrb[4].mxu1 %vm247_vm1, %v2296_v16  ;;  %v229_v27 = vld [vmem:[%s2251_s28 + $0x20] sm:$0xff]  ;;  %v230_v30 = vld [vmem:[%s2251_s28 + $0x30] sm:$0xff] }
  0x1d   : > { %2017 = vmatmul.mubr.msk.f32.vlgmr.msra.gmra.mrb[0].mxu0 %vm247_vm1, %v1788_v17  ;;  %1955 = vmatprep.mubr.msk.f32.mxu1 %vm247_vm1, %v2300_v18  ;;  %v1793_v28 = vld [vmem:[%s2251_s28 + $0x181] sm:$0xff]  ;;  %v1794_v31 = vld [vmem:[%s2251_s28 + $0x191] sm:$0xff] }
  0x1e   : > { %2029 = vmatpush3.msk.msra.mxu0 %vm272_vm0, %v1813_v10  ;;  %2019 = vmatprep.mubr.msk.f32.mxu0 %vm247_vm1, %v1789_v19  ;;  %v231_v32 = vld [vmem:[%s2251_s28 + $0x40] sm:$0xff]  ;;  %v232_v33 = vld [vmem:[%s2251_s28 + $0x50] sm:$0xff] }
  0x1f   : > { %2042 = vmatprep.subr.msk.mxu0 %vm272_vm0, %v1831_v20  ;;  %v233_v34 = vld [vmem:[%s2251_s28 + $0x60] sm:$0xff]  ;;  %v234_v36 = vld [vmem:[%s2251_s28 + $0x70] sm:$0xff] }
  0x20   : > { %1956 = vmatmul.mubr.msk.f32.gmra.mrb[6].mxu1 %vm247_vm1, %v2313_v21  ;;  %v513_v37 = vld [vmem:[%s2251_s28 + $0x1] sm:$0xff]  ;;  %v514_v38 = vld [vmem:[%s2251_s28 + $0x11] sm:$0xff] }
  0x21   : > { %2020 = vmatmul.mubr.msk.f32.gmra.mrb[2].mxu0 %vm247_vm1, %v1790_v22  ;;  %1960 = vmatprep.mubr.msk.f32.mxu1 %vm247_vm1, %v227_v23  ;;  %v515_v39 = vld [vmem:[%s2251_s28 + $0x21] sm:$0xff]  ;;  %v516_v40 = vld [vmem:[%s2251_s28 + $0x31] sm:$0xff] }
  0x22   : > { %2022 = vmatprep.mubr.msk.f32.mxu0 %vm247_vm1, %v1791_v24  ;;  %v1812_v41 = vld [vmem:[%s2251_s28 + $0x80] sm:$0xff]  ;;  %v518_v43 = vld [vmem:[%s2251_s28 + $0x51] sm:$0xff] }
  0x23   : > { %v517_v42 = vld [vmem:[%s2251_s28 + $0x41] sm:$0xff]  ;;  %v520_v45 = vld [vmem:[%s2251_s28 + $0x71] sm:$0xff] }
  0x24   : > { %1961 = vmatmul.mubr.msk.f32.vlgmr.msra.gmra.mrb[0].mxu1 %vm247_vm1, %v228_v25  ;;  %v519_v44 = vld [vmem:[%s2251_s28 + $0x61] sm:$0xff]  ;;  %v1752_v47 = vld [vmem:[%s2251_s28 + $0x130] sm:$0xff] }
  0x25   : > { %2023 = vmatmul.mubr.msk.f32.gmra.mrb[4].mxu0 %vm247_vm1, %v1792_v26  ;;  %1973 = vmatpush3.msk.msra.mxu1 %vm272_vm0, %v1741_v11  ;;  %v1751_v46 = vld [vmem:[%s2251_s28 + $0x120] sm:$0xff]  ;;  %v1754_v49 = vld [vmem:[%s2251_s28 + $0x150] sm:$0xff] }
  0x26   : > { %1963 = vmatprep.mubr.msk.f32.mxu1 %vm247_vm1, %v229_v27  ;;  %2025 = vmatprep.mubr.msk.f32.mxu0 %vm247_vm1, %v1793_v28  ;;  %v1753_v48 = vld [vmem:[%s2251_s28 + $0x140] sm:$0xff]  ;;  %v1830_v50 = vld [vmem:[%s2251_s28 + $0x110] sm:$0xff] }
  0x27   : > { %1986 = vmatprep.subr.msk.mxu1 %vm272_vm0, %v1759_v29  ;;  %v1755_v51 = vld [vmem:[%s2251_s28 + $0x160] sm:$0xff]  ;;  %v1756_v52 = vld [vmem:[%s2251_s28 + $0x170] sm:$0xff] }
  0x28   : > { %1964 = vmatmul.mubr.msk.f32.gmra.mrb[2].mxu1 %vm247_vm1, %v230_v30  ;;  %v1757_v53 = vld [vmem:[%s2251_s28 + $0x180] sm:$0xff]  ;;  %v1758_v54 = vld [vmem:[%s2251_s28 + $0x190] sm:$0xff] }
  0x29   : > { %2026 = vmatmul.mubr.msk.f32.gmra.mrb[6].mxu0 %vm247_vm1, %v1794_v31  ;;  %1966 = vmatprep.mubr.msk.f32.mxu1 %vm247_vm1, %v231_v32  ;;  %v1773_v55 = vld [vmem:[%s2251_s28 + $0x1f0] sm:$0xff]  ;;  %v1774_v56 = vld [vmem:[%s2251_s28 + $0x200] sm:$0xff] }
  0x2a   : > { %2030 = vmatprep.mubr.msk.f32.mxu0 %vm247_vm1, %v228_v25  ;;  %v1775_v57 = vld [vmem:[%s2251_s28 + $0x210] sm:$0xff]  ;;  %v1776_v58 = vld [vmem:[%s2251_s28 + $0x220] sm:$0xff] }
  0x2b   : > { %v1848_v59 = vld [vmem:[%s2251_s28 + $0x81] sm:$0xff] }
  0x2c   : > { %1967 = vmatmul.mubr.msk.f32.gmra.mrb[4].mxu1 %vm247_vm1, %v232_v33 }
  0x2d   : > { %2031 = vmatmul.mubr.msk.f32.vlgmr.msra.gmra.mrb[0].mxu0 %vm247_vm1, %v229_v27  ;;  %1969 = vmatprep.mubr.msk.f32.mxu1 %vm247_vm1, %v233_v34 }
  0x2e   : > { %2043 = vmatpush3.msk.msra.mxu0 %vm272_vm0, %v1831_v20  ;;  %2033 = vmatprep.mubr.msk.f32.mxu0 %vm247_vm1, %v230_v30 }
  0x2f   : > { %2056 = vmatprep.subr.msk.mxu0 %vm272_vm0, %v1849_v35 }
  0x30   : > { %1970 = vmatmul.mubr.msk.f32.gmra.mrb[6].mxu1 %vm247_vm1, %v234_v36 }
  0x31   : > { %2034 = vmatmul.mubr.msk.f32.gmra.mrb[2].mxu0 %vm247_vm1, %v231_v32  ;;  %1974 = vmatprep.mubr.msk.f32.mxu1 %vm247_vm1, %v513_v37 }
  0x32   : > { %2036 = vmatprep.mubr.msk.f32.mxu0 %vm247_vm1, %v232_v33 }
  0x34   : > { %1975 = vmatmul.mubr.msk.f32.vlgmr.msra.gmra.mrb[0].mxu1 %vm247_vm1, %v514_v38 }
  0x35   : > { %2037 = vmatmul.mubr.msk.f32.gmra.mrb[4].mxu0 %vm247_vm1, %v233_v34  ;;  %1987 = vmatpush3.msk.msra.mxu1 %vm272_vm0, %v1759_v29 }
  0x36   : > { %1977 = vmatprep.mubr.msk.f32.mxu1 %vm247_vm1, %v515_v39  ;;  %2039 = vmatprep.mubr.msk.f32.mxu0 %vm247_vm1, %v234_v36 }
  0x37   : > { %2070 = vmatprep.subr.msk.mxu1 %vm272_vm0, %v2231_v1 }
  0x38   : > { %1978 = vmatmul.mubr.msk.f32.gmra.mrb[2].mxu1 %vm247_vm1, %v516_v40 }
  0x39   : > { %2040 = vmatmul.mubr.msk.f32.gmra.mrb[6].mxu0 %vm247_vm1, %v1812_v41  ;;  %1980 = vmatprep.mubr.msk.f32.mxu1 %vm247_vm1, %v517_v42 }
  0x3a   : > { %2044 = vmatprep.mubr.msk.f32.mxu0 %vm247_vm1, %v2256_v6 }
  0x3c   : > { %1981 = vmatmul.mubr.msk.f32.gmra.mrb[4].mxu1 %vm247_vm1, %v518_v43 }
  0x3d   : > { %2045 = vmatmul.mubr.msk.f32.vlgmr.msra.gmra.mrb[0].mxu0 %vm247_vm1, %v2262_v8  ;;  %1983 = vmatprep.mubr.msk.f32.mxu1 %vm247_vm1, %v519_v44 }
  0x3e   : > { %2057 = vmatpush3.msk.msra.mxu0 %vm272_vm0, %v1849_v35  ;;  %2047 = vmatprep.mubr.msk.f32.mxu0 %vm247_vm1, %v2277_v12 }
  0x40   : > { %1984 = vmatmul.mubr.msk.f32.gmra.mrb[6].mxu1 %vm247_vm1, %v520_v45 }
  0x41   : > { %2048 = vmatmul.mubr.msk.f32.gmra.mrb[2].mxu0 %vm247_vm1, %v2284_v14  ;;  %1988 = vmatprep.mubr.msk.f32.mxu1 %vm247_vm1, %v1751_v46 }
  0x42   : > { %2050 = vmatprep.mubr.msk.f32.mxu0 %vm247_vm1, %v2296_v16 }
  0x44   : > { %1989 = vmatmul.mubr.msk.f32.vlgmr.msra.gmra.mrb[0].mxu1 %vm247_vm1, %v1752_v47 }
  0x45   : > { %2051 = vmatmul.mubr.msk.f32.gmra.mrb[4].mxu0 %vm247_vm1, %v2300_v18  ;;  %2071 = vmatpush3.msk.msra.mxu1 %vm272_vm0, %v2231_v1  ;;  %v1859_v1 = vld [vmem:[%s2464_s2] ss:$0 sm:$0xff] }
  0x46   : > { %1991 = vmatprep.mubr.msk.f32.mxu1 %vm247_vm1, %v1753_v48  ;;  %2053 = vmatprep.mubr.msk.f32.mxu0 %vm247_vm1, %v2313_v21 }
  0x48   : > { %1992 = vmatmul.mubr.msk.f32.gmra.mrb[2].mxu1 %vm247_vm1, %v1754_v49 }
  0x49   : > { %2054 = vmatmul.mubr.msk.f32.gmra.mrb[6].mxu0 %vm247_vm1, %v1830_v50  ;;  %1994 = vmatprep.mubr.msk.f32.mxu1 %vm247_vm1, %v1755_v51 }
  0x4a   : > { %2058 = vmatprep.mubr.msk.f32.mxu0 %vm247_vm1, %v514_v38 }
  0x4c   : > { %1995 = vmatmul.mubr.msk.f32.gmra.mrb[4].mxu1 %vm247_vm1, %v1756_v52 }
  0x4d   : > { %2059 = vmatmul.mubr.msk.f32.vlgmr.msra.gmra.mrb[0].mxu0 %vm247_vm1, %v515_v39  ;;  %1997 = vmatprep.mubr.msk.f32.mxu1 %vm247_vm1, %v1757_v53 }
  0x4e   : > { %2061 = vmatprep.mubr.msk.f32.mxu0 %vm247_vm1, %v516_v40 }
  0x50   : > { %1998 = vmatmul.mubr.msk.f32.gmra.mrb[6].mxu1 %vm247_vm1, %v1758_v54 }
  0x51   : > { %2062 = vmatmul.mubr.msk.f32.gmra.mrb[2].mxu0 %vm247_vm1, %v517_v42  ;;  %2008 = vmatprep.mubr.msk.f32.mxu1 %vm247_vm1, %v1773_v55 }
  0x52   : > { %2064 = vmatprep.mubr.msk.f32.mxu0 %vm247_vm1, %v518_v43 }
  0x54   : > { %2009 = vmatmul.mubr.msk.f32.vlgmr.msra.gmra.mrb[4].mxu1 %vm247_vm1, %v1774_v56 }
  0x55   : > { %2065 = vmatmul.mubr.msk.f32.gmra.mrb[4].mxu0 %vm247_vm1, %v519_v44  ;;  %2011 = vmatprep.mubr.msk.f32.mxu1 %vm247_vm1, %v1775_v57 }
  0x56   : > { %2067 = vmatprep.mubr.msk.f32.mxu0 %vm247_vm1, %v520_v45 }
  0x58   : > { %2012 = vmatmul.mubr.msk.f32.gmra.mrb[6].mxu1 %vm247_vm1, %v1776_v58 }
  0x59   : > { %2068 = vmatmul.mubr.msk.f32.gmra.mrb[6].mxu0 %vm247_vm1, %v1848_v59 }
 0x117   : > { %v1990_v60 = vpop.f32.mrb[0].mxu1 }
 0x118   : > { %v767_v61 = vpop.f32.mrb[1].mxu1 }
 0x11b   : > { %v1993_v62 = vpop.f32.mrb[2].mxu1 }
 0x11c   : > { %v777_v63 = vpop.f32.mrb[3].mxu1 }
 0x120   : > { %v2060_v0 = vpop.f32.mrb[0].mxu0 }
 0x121   : > { %v2072_v2 = vadd.f32 %v2060_v0, %v1990_v60  ;;  %v1520_v3 = vpop.f32.mrb[1].mxu0 }
 0x122   : > { %v2073_v4 = vadd.f32 %v1520_v3, %v767_v61 }
 0x123   : > { %v1575_v5 = vadd.f32 %v2072_v2, %v1859_v1 }
 0x124   : > { %v1574_v6 = vadd.f32 %v2073_v4, %v1859_v1  ;;  %v2063_v7 = vpop.f32.mrb[2].mxu0 }
 0x125   : > { %v1583_v8 = vmax.f32 %v1575_v5, 0.0  ;;  %v2074_v9 = vadd.f32 %v2063_v7, %v1993_v62  ;;  %v1530_v10 = vpop.f32.mrb[3].mxu0 }
 0x126   : > { %v1582_v11 = vmax.f32 %v1574_v6, 0.0  ;;  %v2075_v12 = vadd.f32 %v1530_v10, %v777_v63 }
 0x127   : > { %1591 = vst [vmem:[%s2443_s21 + $0x8] sm:$0xff] %v1583_v8  ;;  %v1577_v13 = vadd.f32 %v2074_v9, %v1859_v1  ;;  %v2010_v15 = vpop.f32.mrb[4].mxu1 }
 0x128   : > { %1590 = vst [vmem:[%s2443_s21] sm:$0xff] %v1582_v11  ;;  %v1576_v14 = vadd.f32 %v2075_v12, %v1859_v1  ;;  %v2066_v16 = vpop.f32.mrb[4].mxu0  ;;  %v938_v19 = vpop.f32.mrb[5].mxu1 }
 0x129   : > { %v1585_v17 = vmax.f32 %v1577_v13, 0.0  ;;  %v2076_v18 = vadd.f32 %v2066_v16, %v2010_v15  ;;  %v1540_v20 = vpop.f32.mrb[5].mxu0 }
 0x12a   : > { %v1584_v21 = vmax.f32 %v1576_v14, 0.0  ;;  %v2077_v22 = vadd.f32 %v1540_v20, %v938_v19 }
 0x12b   : > { %1593 = vst [vmem:[%s2443_s21 + $0x18] sm:$0xff] %v1585_v17  ;;  %v1579_v23 = vadd.f32 %v2076_v18, %v1859_v1  ;;  %v2013_v25 = vpop.f32.mrb[6].mxu1 }
 0x12c   : > { %1592 = vst [vmem:[%s2443_s21 + $0x10] sm:$0xff] %v1584_v21  ;;  %v1578_v24 = vadd.f32 %v2077_v22, %v1859_v1  ;;  %v2069_v26 = vpop.f32.mrb[6].mxu0  ;;  %v948_v29 = vpop.f32.mrb[7].mxu1 }
 0x12d   : > { %v1587_v27 = vmax.f32 %v1579_v23, 0.0  ;;  %v2078_v28 = vadd.f32 %v2069_v26, %v2013_v25  ;;  %v1550_v30 = vpop.f32.mrb[7].mxu0 }
 0x12e   : > { %v1586_v31 = vmax.f32 %v1578_v24, 0.0  ;;  %v2079_v32 = vadd.f32 %v1550_v30, %v948_v29 }
 0x12f   : > { %1595 = vst [vmem:[%s2443_s21 + $0x28] sm:$0xff] %v1587_v27  ;;  %v1581_v33 = vadd.f32 %v2078_v28, %v1859_v1 }
 0x130   : > { %1594 = vst [vmem:[%s2443_s21 + $0x20] sm:$0xff] %v1586_v31  ;;  %v1580_v34 = vadd.f32 %v2079_v32, %v1859_v1 }
 0x131   : > { %v1589_v35 = vmax.f32 %v1581_v33, 0.0 }
 0x132   : > { %v1588_v36 = vmax.f32 %v1580_v34, 0.0 }
 0x133   : > { %1597 = vst [vmem:[%s2443_s21 + $0x38] sm:$0xff] %v1589_v35 }
 0x134   : > { %1596 = vst [vmem:[%s2443_s21 + $0x30] sm:$0xff] %v1588_v36 }
 0x135 PF: > { %s13_s14 = sadd.s32 1, %s2183_s14   ;;  %s2466_s12 = smov %s2179_s13 }
 0x136   : > { %p10_p6 = scmp.ge.s32.totalorder %s13_s14, 4   ;;  %s2467_s13 = smov %s2469_s15 }
 0x138   :  { %12 = sbr.rel (!%p10_p6) target bundleno = 2 (0x2), region = 81 }

// kernel: basic_block.3
= control target key start
LH: loop header
LB: loop body
LE: loop exit
PB: predicated region body
PF: predicated region fallthrough
CT: control target
= control target key end

     0   :  { %s3214_s21 = smov 0   ;;  %s3216_s22 = smov 0   ;;  %s3875_s0 = inlined_call_operand.vmem [shape: f32[2,10,10,128], index: 0, kind: input, shape index: {}]   ;;  %s3876_s1 = inlined_call_operand.vmem [shape: f32[9,128,128], index: 1, kind: input, shape index: {}]   ;;  %s3877_s2 = inlined_call_operand.vmem [shape: f32[1,128], index: 2, kind: input, shape index: {}]   ;;  %s3878_s3 = inlined_call_operand.vmem [shape: f32[2,8,8,4], index: 3, kind: input, shape index: {}]   ;;  %s3879_s4 = inlined_call_operand.vmem [shape: f32[1,4,128], index: 4, kind: input, shape index: {}]   ;;  %s3880_s5 = inlined_call_operand.vmem [shape: f32[1,128], index: 5, kind: input, shape index: {}]   ;;  %s3881_s6 = inlined_call_operand.vmem [shape: f32[2,8,8,128], index: 6, kind: output, shape index: {}]  }
   0x1   :  { %s3218_s23 = smov 0  }
   0x2 LB: > { %s28_s24 = sadd.s32 1, %s3173_s22  ;;  %p1930_p0 = scmp.ge.s32.totalorder %s3177_s23, 1  ;;  %s3177_s23 = sphi %s3218_s23, %s16_s23   ;;  %s3173_s22 = sphi %s3216_s22, %s3883_s22   ;;  %s3169_s21 = sphi %s3214_s21, %s3882_s21  }
   0x3   : > { %p30_p1 = scmp.ge.s32.totalorder %s28_s24, 2  ;;  %p270_p2 = scmp.lt.s32.totalorder %s3177_s23, 3 }
   0x5   : > { %s3885_s24 = smov (%p30_p1, %s28_s24), 0  ;;  %p271_p3 = pnand %p1930_p0, %p270_p2 }
   0x6   : > { %v1936_v0 = vld [vmem:[%s3876_s1 + $0x80] sm:$0xff] (!%p271_p3)  ;;  %v1937_v1 = vld [vmem:[%s3876_s1 + $0x88] sm:$0xff] (!%p271_p3)  ;;  %p322_p4 = scmp.lt.s32.totalorder (!%p271_p3), %s3169_s21, 1  ;;  %v1938_v5 = vld [vmem:[%s3876_s1 + $0x90] sm:$0xff] (!%p271_p3)  ;;  %vm1615_vm0 = vcmask (!%p271_p3), 1043456   ;;  %vm1590_vm1 = vcmask (!%p271_p3), 31744  }
   0x7   : > { %274 = sbr.rel (%p271_p3) target bundleno = 403 (0x193), region = 44  ;;  %v2024_v2 = vld [vmem:[%s3876_s1 + $0x280] sm:$0xff] (!%p271_p3)  ;;  %v2762_v3 = vpack.c.bf16 (!%p271_p3), %v1937_v1, %v1936_v0  ;;  %v2025_v4 = vld [vmem:[%s3876_s1 + $0x288] sm:$0xff] (!%p271_p3)  ;;  %v1939_v6 = vld [vmem:[%s3876_s1 + $0x98] sm:$0xff] (!%p271_p3) }
   0x8   : > { %v2922_v7 = vpack.c.bf16 (!%p271_p3), %v2025_v4, %v2024_v2  ;;  %v2766_v8 = vpack.c.bf16 (!%p271_p3), %v1939_v6, %v1938_v5  ;;  %v2026_v9 = vld [vmem:[%s3876_s1 + $0x290] sm:$0xff] (!%p271_p3)  ;;  %v2027_v10 = vld [vmem:[%s3876_s1 + $0x298] sm:$0xff] (!%p271_p3)  ;;  %v1940_v11 = vld [vmem:[%s3876_s1 + $0xa0] sm:$0xff] (!%p271_p3) }
   0x9   : > { %2763 = vmatprep.subr.bf16.mxu1 (!%p271_p3), %v2762_v3  ;;  %v2926_v12 = vpack.c.bf16 (!%p271_p3), %v2027_v10, %v2026_v9  ;;  %v1941_v13 = vld [vmem:[%s3876_s1 + $0xa8] sm:$0xff] (!%p271_p3)  ;;  %v2028_v14 = vld [vmem:[%s3876_s1 + $0x2a0] sm:$0xff] (!%p271_p3)  ;;  %v1942_v18 = vld [vmem:[%s3876_s1 + $0xb0] sm:$0xff] (!%p271_p3) }
   0xa   : > { %v2029_v15 = vld [vmem:[%s3876_s1 + $0x2a8] sm:$0xff] (!%p271_p3)  ;;  %2923 = vmatprep.subr.bf16.mxu0 (!%p271_p3), %v2922_v7  ;;  %2765 = vmatpush3.bf16.msra.mxu1 (!%p271_p3), %v2762_v3  ;;  %v2770_v16 = vpack.c.bf16 (!%p271_p3), %v1941_v13, %v1940_v11  ;;  %v1943_v19 = vld [vmem:[%s3876_s1 + $0xb8] sm:$0xff] (!%p271_p3)  ;;  %v2030_v20 = vld [vmem:[%s3876_s1 + $0x2b0] sm:$0xff] (!%p271_p3) }
   0xb   : > { %2925 = vmatpush3.bf16.msra.mxu0 (!%p271_p3), %v2922_v7  ;;  %2767 = vmatprep.subr.bf16.mxu1 (!%p271_p3), %v2766_v8  ;;  %v2930_v17 = vpack.c.bf16 (!%p271_p3), %v2029_v15, %v2028_v14  ;;  %v2031_v21 = vld [vmem:[%s3876_s1 + $0x2b8] sm:$0xff] (!%p271_p3)  ;;  %v2774_v22 = vpack.c.bf16 (!%p271_p3), %v1943_v19, %v1942_v18  ;;  %v1944_v24 = vld [vmem:[%s3876_s1 + $0xc0] sm:$0xff] (!%p271_p3)  ;;  %v1945_v25 = vld [vmem:[%s3876_s1 + $0xc8] sm:$0xff] (!%p271_p3) }
   0xc   : > { %2927 = vmatprep.subr.bf16.mxu0 (!%p271_p3), %v2926_v12  ;;  %v2934_v23 = vpack.c.bf16 (!%p271_p3), %v2031_v21, %v2030_v20  ;;  %v2032_v27 = vld [vmem:[%s3876_s1 + $0x2c0] sm:$0xff] (!%p271_p3)  ;;  %v2033_v28 = vld [vmem:[%s3876_s1 + $0x2c8] sm:$0xff] (!%p271_p3)  ;;  %v2778_v30 = vpack.c.bf16 (!%p271_p3), %v1945_v25, %v1944_v24  ;;  %v1946_v32 = vld [vmem:[%s3876_s1 + $0xd0] sm:$0xff] (!%p271_p3) }
   0xd   : > { %v2938_v31 = vpack.c.bf16 (!%p271_p3), %v2033_v28, %v2032_v27  ;;  %v1947_v33 = vld [vmem:[%s3876_s1 + $0xd8] sm:$0xff] (!%p271_p3)  ;;  %v2034_v34 = vld [vmem:[%s3876_s1 + $0x2d0] sm:$0xff] (!%p271_p3)  ;;  %v1948_v38 = vld [vmem:[%s3876_s1 + $0xe0] sm:$0xff] (!%p271_p3) }
   0xe   : > { %s3887_s21 = smov (!%p322_p4, %s3169_s21), 1  ;;  %2769 = vmatpush3.bf16.msra.mxu1 %v2766_v8  ;;  %v2035_v35 = vld [vmem:[%s3876_s1 + $0x2d8] sm:$0xff]  ;;  %v2782_v36 = vpack.c.bf16 %v1947_v33, %v1946_v32  ;;  %v1949_v39 = vld [vmem:[%s3876_s1 + $0xe8] sm:$0xff]  ;;  %v2036_v40 = vld [vmem:[%s3876_s1 + $0x2e0] sm:$0xff] }
   0xf   : > { %s3130_s29 = smul.u32 160, %s3887_s21  ;;  %2929 = vmatpush3.bf16.msra.mxu0 %v2926_v12  ;;  %2771 = vmatprep.subr.bf16.mxu1 %v2770_v16  ;;  %v2942_v37 = vpack.c.bf16 %v2035_v35, %v2034_v34  ;;  %v2037_v41 = vld [vmem:[%s3876_s1 + $0x2e8] sm:$0xff]  ;;  %v2786_v42 = vpack.c.bf16 %v1949_v39, %v1948_v38  ;;  %v1950_v44 = vld [vmem:[%s3876_s1 + $0xf0] sm:$0xff]  ;;  %v1951_v45 = vld [vmem:[%s3876_s1 + $0xf8] sm:$0xff]  ;;  %s2125_s11 = sshll.u32 %s3887_s21, 6 }
  0x10   : > { %2931 = vmatprep.subr.bf16.mxu0 %v2930_v17  ;;  %v2946_v43 = vpack.c.bf16 %v2037_v41, %v2036_v40  ;;  %v2038_v46 = vld [vmem:[%s3876_s1 + $0x2f0] sm:$0xff]  ;;  %v2039_v47 = vld [vmem:[%s3876_s1 + $0x2f8] sm:$0xff]  ;;  %v2790_v48 = vpack.c.bf16 %v1951_v45, %v1950_v44  ;;  %v362_v50 = vld [vmem:[%s3876_s1] sm:$0xff]  ;;  %s3795_s19 = scalar_lea.vmem %s3878_s3, %s2125_s11 }
  0x11   : > { %s3286_s16 = scalar_lea.vmem %s3875_s0, %s3130_s29  ;;  %v2950_v49 = vpack.c.bf16 %v2039_v47, %v2038_v46  ;;  %v363_v51 = vld [vmem:[%s3876_s1 + $0x8] sm:$0xff]  ;;  %v2048_v52 = vld [vmem:[%s3876_s1 + $0x300] sm:$0xff]  ;;  %v364_v56 = vld [vmem:[%s3876_s1 + $0x10] sm:$0xff] }
  0x12   : > { %v378_v26 = vld [vmem:[%s3286_s16 + $0x1] sm:$0xff]  ;;  %v3302_v29 = vld [vmem:[%s3286_s16 + $0x12] sm:$0xff]  ;;  %2773 = vmatpush3.bf16.msra.mxu1 %v2770_v16  ;;  %v2794_v54 = vpack.c.bf16 %v363_v51, %v362_v50 }
  0x13   : > { %2384 = vmatprep.mubr.f32.mxu1 %v378_v26  ;;  %2604 = vmatprep.mubr.f32.mxu0 %v3302_v29  ;;  %v2049_v53 = vld [vmem:[%s3876_s1 + $0x308] sm:$0xff]  ;;  %v365_v57 = vld [vmem:[%s3876_s1 + $0x18] sm:$0xff]  ;;  %v2050_v58 = vld [vmem:[%s3876_s1 + $0x310] sm:$0xff] }
  0x14   : > { %2933 = vmatpush3.bf16.msra.mxu0 %v2930_v17  ;;  %2775 = vmatprep.subr.bf16.mxu1 %v2774_v22  ;;  %v2954_v55 = vpack.c.bf16 %v2049_v53, %v2048_v52  ;;  %v2051_v59 = vld [vmem:[%s3876_s1 + $0x318] sm:$0xff]  ;;  %v3369_v61 = vld [vmem:[%s3286_s16 + $0x22] sm:$0xff]  ;;  %v2798_v62 = vpack.c.bf16 %v365_v57, %v364_v56  ;;  %v368_v10 = vld [vmem:[%s3876_s1 + $0x30] sm:$0xff] }
  0x15   : > { %2935 = vmatprep.subr.bf16.mxu0 %v2934_v23  ;;  %v3366_v60 = vld [vmem:[%s3286_s16 + $0x11] sm:$0xff]  ;;  %v2958_v63 = vpack.c.bf16 %v2051_v59, %v2050_v58  ;;  %v366_v0 = vld [vmem:[%s3876_s1 + $0x20] sm:$0xff]  ;;  %v367_v1 = vld [vmem:[%s3876_s1 + $0x28] sm:$0xff] }
  0x16   : > { %2777 = vmatpush3.bf16.msra.mxu1 %v2774_v22  ;;  %v2052_v2 = vld [vmem:[%s3876_s1 + $0x320] sm:$0xff]  ;;  %v2053_v3 = vld [vmem:[%s3876_s1 + $0x328] sm:$0xff]  ;;  %v3389_v5 = vld [vmem:[%s3286_s16 + $0x32] sm:$0xff]  ;;  %v2802_v7 = vpack.c.bf16 %v367_v1, %v366_v0 }
  0x17   : > { %2779 = vmatprep.subr.bf16.mxu1 %v2778_v30  ;;  %v3385_v4 = vld [vmem:[%s3286_s16 + $0x21] sm:$0xff]  ;;  %v3392_v6 = vld [vmem:[%s3286_s16 + $0x31] sm:$0xff]  ;;  %v2962_v9 = vpack.c.bf16 %v2053_v3, %v2052_v2 }
  0x18   : > { %2937 = vmatpush3.bf16.msra.mxu0 %v2934_v23  ;;  %v3395_v8 = vld [vmem:[%s3286_s16 + $0x42] sm:$0xff]  ;;  %v369_v11 = vld [vmem:[%s3876_s1 + $0x38] sm:$0xff]  ;;  %v2054_v12 = vld [vmem:[%s3876_s1 + $0x330] sm:$0xff] }
  0x19   : > { %2939 = vmatprep.subr.bf16.mxu0 %v2938_v31  ;;  %v2055_v13 = vld [vmem:[%s3876_s1 + $0x338] sm:$0xff]  ;;  %v3413_v14 = vld [vmem:[%s3286_s16 + $0x41] sm:$0xff]  ;;  %v2806_v17 = vpack.c.bf16 %v369_v11, %v368_v10  ;;  %v2058_v33 = vld [vmem:[%s3876_s1 + $0x350] sm:$0xff] }
  0x1a   : > { %2781 = vmatpush3.bf16.msra.mxu1 %v2778_v30  ;;  %v3417_v15 = vld [vmem:[%s3286_s16 + $0x52] sm:$0xff]  ;;  %v3423_v18 = vld [vmem:[%s3286_s16 + $0x62] sm:$0xff]  ;;  %v2966_v19 = vpack.c.bf16 %v2055_v13, %v2054_v12 }
  0x1b   : > { %2783 = vmatprep.subr.bf16.mxu1 %v2782_v36  ;;  %v3420_v16 = vld [vmem:[%s3286_s16 + $0x51] sm:$0xff]  ;;  %v370_v20 = vld [vmem:[%s3876_s1 + $0x40] sm:$0xff]  ;;  %v371_v21 = vld [vmem:[%s3876_s1 + $0x48] sm:$0xff] }
  0x1c   : > { %2941 = vmatpush3.bf16.msra.mxu0 %v2938_v31  ;;  %v2056_v22 = vld [vmem:[%s3876_s1 + $0x340] sm:$0xff]  ;;  %v2057_v23 = vld [vmem:[%s3876_s1 + $0x348] sm:$0xff]  ;;  %v3445_v25 = vld [vmem:[%s3286_s16 + $0x72] sm:$0xff]  ;;  %v2810_v27 = vpack.c.bf16 %v371_v21, %v370_v20 }
  0x1d   : > { %2943 = vmatprep.subr.bf16.mxu0 %v2942_v37  ;;  %v3441_v24 = vld [vmem:[%s3286_s16 + $0x61] sm:$0xff]  ;;  %v3448_v26 = vld [vmem:[%s3286_s16 + $0x71] sm:$0xff]  ;;  %v2970_v30 = vpack.c.bf16 %v2057_v23, %v2056_v22 }
  0x1e   : > { %2785 = vmatpush3.bf16.msra.mxu1 %v2782_v36  ;;  %v3451_v28 = vld [vmem:[%s3286_s16 + $0x82] sm:$0xff]  ;;  %v372_v31 = vld [vmem:[%s3876_s1 + $0x50] sm:$0xff]  ;;  %v373_v32 = vld [vmem:[%s3876_s1 + $0x58] sm:$0xff] }
  0x1f   : > { %2787 = vmatprep.subr.bf16.mxu1 %v2786_v42  ;;  %v2059_v34 = vld [vmem:[%s3876_s1 + $0x358] sm:$0xff]  ;;  %v354_v35 = vld [vmem:[%s3286_s16] sm:$0xff]  ;;  %v375_v40 = vld [vmem:[%s3876_s1 + $0x68] sm:$0xff] }
  0x20   : > { %2945 = vmatpush3.bf16.msra.mxu0 %v2942_v37  ;;  %v3471_v36 = vld [vmem:[%s3286_s16 + $0x20] sm:$0xff]  ;;  %v2814_v37 = vpack.c.bf16 %v373_v32, %v372_v31  ;;  %v2974_v38 = vpack.c.bf16 %v2059_v34, %v2058_v33  ;;  %v376_v45 = vld [vmem:[%s3876_s1 + $0x70] sm:$0xff]  ;;  %v377_v46 = vld [vmem:[%s3876_s1 + $0x78] sm:$0xff] }
  0x21   : > { %2947 = vmatprep.subr.bf16.mxu0 %v2946_v43  ;;  %v374_v39 = vld [vmem:[%s3876_s1 + $0x60] sm:$0xff]  ;;  %v2062_v47 = vld [vmem:[%s3876_s1 + $0x370] sm:$0xff]  ;;  %v1953_v52 = vld [vmem:[%s3876_s1 + $0x108] sm:$0xff] }
  0x22   : > { %2789 = vmatpush3.bf16.msra.mxu1 %v2786_v42  ;;  %v2060_v41 = vld [vmem:[%s3876_s1 + $0x360] sm:$0xff]  ;;  %v2061_v42 = vld [vmem:[%s3876_s1 + $0x368] sm:$0xff]  ;;  %v1954_v57 = vld [vmem:[%s3876_s1 + $0x110] sm:$0xff] }
  0x23   : > { %2791 = vmatprep.subr.bf16.mxu1 %v2790_v48  ;;  %v2978_v44 = vpack.c.bf16 %v2061_v42, %v2060_v41  ;;  %v1952_v51 = vld [vmem:[%s3876_s1 + $0x100] sm:$0xff]  ;;  %v1955_v58 = vld [vmem:[%s3876_s1 + $0x118] sm:$0xff]  ;;  %v2074_v59 = vld [vmem:[%s3876_s1 + $0x390] sm:$0xff] }
  0x24   : > { %2949 = vmatpush3.bf16.msra.mxu0 %v2946_v43  ;;  %v2818_v43 = vpack.c.bf16 %v375_v40, %v374_v39  ;;  %v2072_v53 = vld [vmem:[%s3876_s1 + $0x380] sm:$0xff]  ;;  %v3526_v0 = vld [vmem:[%s3286_s16 + $0x30] sm:$0xff]  ;;  %v2830_v1 = vpack.c.bf16 %v1955_v58, %v1954_v57  ;;  %v2077_v10 = vld [vmem:[%s3876_s1 + $0x3a8] sm:$0xff] }
  0x25   : > { %2951 = vmatprep.subr.bf16.mxu0 %v2950_v49  ;;  %v1956_v3 = vld [vmem:[%s3876_s1 + $0x120] sm:$0xff]  ;;  %v3546_v13 = vld [vmem:[%s3286_s16 + $0x50] sm:$0xff]  ;;  %v1959_v20 = vld [vmem:[%s3876_s1 + $0x138] sm:$0xff] }
  0x26   : > { %2793 = vmatpush3.bf16.msra.mxu1 %v2790_v48  ;;  %v2063_v48 = vld [vmem:[%s3876_s1 + $0x378] sm:$0xff]  ;;  %v3543_v11 = vld [vmem:[%s3286_s16 + $0x40] sm:$0xff]  ;;  %v2078_v21 = vld [vmem:[%s3876_s1 + $0x3b0] sm:$0xff] }
  0x27   : > { %2795 = vmatprep.subr.bf16.mxu1 %v2794_v54  ;;  %v2982_v50 = vpack.c.bf16 %v2063_v48, %v2062_v47  ;;  %v2079_v22 = vld [vmem:[%s3876_s1 + $0x3b8] sm:$0xff]  ;;  %v3565_v23 = vld [vmem:[%s3286_s16 + $0x60] sm:$0xff]  ;;  %v1961_v33 = vld [vmem:[%s3876_s1 + $0x148] sm:$0xff] }
  0x28   : > { %2953 = vmatpush3.bf16.msra.mxu0 %v2950_v49  ;;  %v2822_v49 = vpack.c.bf16 %v377_v46, %v376_v45  ;;  %v2998_v31 = vpack.c.bf16 %v2079_v22, %v2078_v21  ;;  %v1960_v32 = vld [vmem:[%s3876_s1 + $0x140] sm:$0xff]  ;;  %v2047_v39 = vld [vmem:[%s3286_s16 + $0x90] sm:$0xff]  ;;  %v1963_v42 = vld [vmem:[%s3876_s1 + $0x158] sm:$0xff] }
  0x29   : > { %2955 = vmatprep.subr.bf16.mxu0 %v2954_v55  ;;  %2385 = vmatmul.mubr.f32.vlgmr.msra.gmra.mrb[0].mxu1 %v3366_v60  ;;  %v2080_v34 = vld [vmem:[%s3876_s1 + $0x3c0] sm:$0xff]  ;;  %v1962_v41 = vld [vmem:[%s3876_s1 + $0x150] sm:$0xff]  ;;  %v2087_v57 = vld [vmem:[%s3876_s1 + $0x3f8] sm:$0xff] }
  0x2a   : > { %2797 = vmatpush3.bf16.msra.mxu1 %v2794_v54  ;;  %2387 = vmatprep.mubr.f32.mxu1 %v3385_v4  ;;  %v2073_v54 = vld [vmem:[%s3876_s1 + $0x388] sm:$0xff]  ;;  %v2846_v46 = vpack.c.bf16 %v1963_v42, %v1962_v41  ;;  %v1964_v48 = vld [vmem:[%s3876_s1 + $0x160] sm:$0xff] }
  0x2b   : > { %2605 = vmatmul.mubr.f32.vlgmr.msra.gmra.mrb[0].mxu0 %v3369_v61  ;;  %2799 = vmatprep.subr.bf16.mxu1 %v2798_v62  ;;  %v2986_v56 = vpack.c.bf16 %v2073_v54, %v2072_v53  ;;  %v613_v45 = vld [vmem:[%s3286_s16 + $0x2] sm:$0xff]  ;;  %v1966_v54 = vld [vmem:[%s3876_s1 + $0x170] sm:$0xff] }
  0x2c   : > { %2957 = vmatpush3.bf16.msra.mxu0 %v2954_v55  ;;  %2607 = vmatprep.mubr.f32.mxu0 %v3389_v5  ;;  %v2826_v55 = vpack.c.bf16 %v1953_v52, %v1952_v51  ;;  %v2085_v51 = vld [vmem:[%s3876_s1 + $0x3e8] sm:$0xff]  ;;  %v1980_v22 = vld [vmem:[%s3876_s1 + $0x1a0] sm:$0xff] }
  0x2d   : > { %2959 = vmatprep.subr.bf16.mxu0 %v2958_v63  ;;  %2388 = vmatmul.mubr.f32.gmra.mrb[2].mxu1 %v3392_v6  ;;  %v1984_v42 = vld [vmem:[%s3876_s1 + $0x1c0] sm:$0xff] }
  0x2e   : > { %2801 = vmatpush3.bf16.msra.mxu1 %v2798_v62  ;;  %2390 = vmatprep.mubr.f32.mxu1 %v3413_v14  ;;  %v2075_v62 = vld [vmem:[%s3876_s1 + $0x398] sm:$0xff] }
  0x2f   : > { %2608 = vmatmul.mubr.f32.gmra.mrb[2].mxu0 %v3395_v8  ;;  %2803 = vmatprep.subr.bf16.mxu1 %v2802_v7  ;;  %v2990_v2 = vpack.c.bf16 %v2075_v62, %v2074_v59  ;;  %v1976_v62 = vld [vmem:[%s3876_s1 + $0x180] sm:$0xff] }
  0x30   : > { %2961 = vmatpush3.bf16.msra.mxu0 %v2958_v63  ;;  %2610 = vmatprep.mubr.f32.mxu0 %v3417_v15  ;;  %v3523_v63 = vld [vmem:[%s3286_s16 + $0x10] sm:$0xff] }
  0x31   : > { %2963 = vmatprep.subr.bf16.mxu0 %v2962_v9  ;;  %2391 = vmatmul.mubr.f32.gmra.mrb[4].mxu1 %v3420_v16 }
  0x32   : > { %2805 = vmatpush3.bf16.msra.mxu1 %v2802_v7  ;;  %2393 = vmatprep.mubr.f32.mxu1 %v3441_v24  ;;  %v1957_v7 = vld [vmem:[%s3876_s1 + $0x128] sm:$0xff] }
  0x33   : > { %2611 = vmatmul.mubr.f32.gmra.mrb[4].mxu0 %v3423_v18  ;;  %2807 = vmatprep.subr.bf16.mxu1 %v2806_v17  ;;  %v2834_v12 = vpack.c.bf16 %v1957_v7, %v1956_v3  ;;  %v2097_v3 = vld [vmem:[%s3876_s1 + $0x408] sm:$0xff] }
  0x34   : > { %2965 = vmatpush3.bf16.msra.mxu0 %v2962_v9  ;;  %2613 = vmatprep.mubr.f32.mxu0 %v3445_v25  ;;  %v2076_v9 = vld [vmem:[%s3876_s1 + $0x3a0] sm:$0xff] }
  0x35   : > { %2967 = vmatprep.subr.bf16.mxu0 %v2966_v19  ;;  %2394 = vmatmul.mubr.f32.gmra.mrb[6].mxu1 %v3448_v26 }
  0x36   : > { %2809 = vmatpush3.bf16.msra.mxu1 %v2806_v17  ;;  %2428 = vmatprep.mubr.f32.mxu1 %v354_v35  ;;  %v2994_v17 = vpack.c.bf16 %v2077_v10, %v2076_v9  ;;  %v2081_v35 = vld [vmem:[%s3876_s1 + $0x3c8] sm:$0xff]  ;;  %v1978_v10 = vld [vmem:[%s3876_s1 + $0x190] sm:$0xff] }
  0x37   : > { %2614 = vmatmul.mubr.f32.gmra.mrb[6].mxu0 %v3451_v28  ;;  %2811 = vmatprep.subr.bf16.mxu1 %v2810_v27  ;;  %v3002_v40 = vpack.c.bf16 %v2081_v35, %v2080_v34  ;;  %v1983_v35 = vld [vmem:[%s3876_s1 + $0x1b8] sm:$0xff] }
  0x38   : > { %2969 = vmatpush3.bf16.msra.mxu0 %v2966_v19  ;;  %2648 = vmatprep.mubr.f32.mxu0 %v3471_v36  ;;  %v1958_v19 = vld [vmem:[%s3876_s1 + $0x130] sm:$0xff] }
  0x39   : > { %2971 = vmatprep.subr.bf16.mxu0 %v2970_v30 }
  0x3a   : > { %2813 = vmatpush3.bf16.msra.mxu1 %v2810_v27  ;;  %v2838_v27 = vpack.c.bf16 %v1959_v20, %v1958_v19  ;;  %v2099_v19 = vld [vmem:[%s3876_s1 + $0x418] sm:$0xff] }
  0x3b   : > { %2815 = vmatprep.subr.bf16.mxu1 %v2814_v37 }
  0x3c   : > { %2973 = vmatpush3.bf16.msra.mxu0 %v2970_v30  ;;  %v3568_v30 = vld [vmem:[%s3286_s16 + $0x70] sm:$0xff] }
  0x3d   : > { %2975 = vmatprep.subr.bf16.mxu0 %v2974_v38 }
  0x3e   : > { %2817 = vmatpush3.bf16.msra.mxu1 %v2814_v37  ;;  %v3587_v37 = vld [vmem:[%s3286_s16 + $0x80] sm:$0xff] }
  0x3f   : > { %2819 = vmatprep.subr.bf16.mxu1 %v2818_v43 }
  0x40   : > { %2977 = vmatpush3.bf16.msra.mxu0 %v2974_v38  ;;  %v2842_v38 = vpack.c.bf16 %v1961_v33, %v1960_v32  ;;  %v2101_v32 = vld [vmem:[%s3876_s1 + $0x428] sm:$0xff] }
  0x41   : > { %2979 = vmatprep.subr.bf16.mxu0 %v2978_v44 }
  0x42   : > { %2821 = vmatpush3.bf16.msra.mxu1 %v2818_v43  ;;  %v2082_v43 = vld [vmem:[%s3876_s1 + $0x3d0] sm:$0xff] }
  0x43   : > { %2823 = vmatprep.subr.bf16.mxu1 %v2822_v49 }
  0x44   : > { %2981 = vmatpush3.bf16.msra.mxu0 %v2978_v44  ;;  %v2083_v44 = vld [vmem:[%s3876_s1 + $0x3d8] sm:$0xff] }
  0x45   : > { %2983 = vmatprep.subr.bf16.mxu0 %v2982_v50  ;;  %v3006_v47 = vpack.c.bf16 %v2083_v44, %v2082_v43  ;;  %v1985_v43 = vld [vmem:[%s3876_s1 + $0x1c8] sm:$0xff]  ;;  %v2104_v44 = vld [vmem:[%s3876_s1 + $0x440] sm:$0xff] }
  0x46   : > { %2825 = vmatpush3.bf16.msra.mxu1 %v2822_v49  ;;  %v1965_v49 = vld [vmem:[%s3876_s1 + $0x168] sm:$0xff] }
  0x47   : > { %2827 = vmatprep.subr.bf16.mxu1 %v2826_v55  ;;  %v2850_v52 = vpack.c.bf16 %v1965_v49, %v1964_v48  ;;  %v2071_v48 = vld [vmem:[%s3286_s16 + $0x91] sm:$0xff] }
  0x48   : > { %2985 = vmatpush3.bf16.msra.mxu0 %v2982_v50  ;;  %v2084_v50 = vld [vmem:[%s3876_s1 + $0x3e0] sm:$0xff] }
  0x49   : > { %2987 = vmatprep.subr.bf16.mxu0 %v2986_v56  ;;  %2429 = vmatmul.mubr.f32.vlgmr.msra.gmra.mrb[0].mxu1 %v3523_v63  ;;  %v3010_v53 = vpack.c.bf16 %v2085_v51, %v2084_v50  ;;  %v1986_v50 = vld [vmem:[%s3876_s1 + $0x1d0] sm:$0xff]  ;;  %v1987_v51 = vld [vmem:[%s3876_s1 + $0x1d8] sm:$0xff] }
  0x4a   : > { %2829 = vmatpush3.bf16.msra.mxu1 %v2826_v55  ;;  %2431 = vmatprep.mubr.f32.mxu1 %v3471_v36  ;;  %v1967_v55 = vld [vmem:[%s3876_s1 + $0x178] sm:$0xff] }
  0x4b   : > { %2649 = vmatmul.mubr.f32.vlgmr.msra.gmra.mrb[0].mxu0 %v3526_v0  ;;  %2831 = vmatprep.subr.bf16.mxu1 %v2830_v1  ;;  %v2854_v58 = vpack.c.bf16 %v1967_v55, %v1966_v54  ;;  %v2878_v54 = vpack.c.bf16 %v1987_v51, %v1986_v50 }
  0x4c   : > { %2989 = vmatpush3.bf16.msra.mxu0 %v2986_v56  ;;  %2651 = vmatprep.mubr.f32.mxu0 %v3543_v11  ;;  %v2086_v56 = vld [vmem:[%s3876_s1 + $0x3f0] sm:$0xff] }
  0x4d   : > { %2991 = vmatprep.subr.bf16.mxu0 %v2990_v2  ;;  %2432 = vmatmul.mubr.f32.gmra.mrb[2].mxu1 %v3526_v0  ;;  %v3014_v59 = vpack.c.bf16 %v2087_v57, %v2086_v56  ;;  %v1988_v56 = vld [vmem:[%s3876_s1 + $0x1e0] sm:$0xff]  ;;  %v1989_v57 = vld [vmem:[%s3876_s1 + $0x1e8] sm:$0xff] }
  0x4e   : > { %2833 = vmatpush3.bf16.msra.mxu1 %v2830_v1  ;;  %2434 = vmatprep.mubr.f32.mxu1 %v3543_v11  ;;  %v1977_v1 = vld [vmem:[%s3876_s1 + $0x188] sm:$0xff] }
  0x4f   : > { %2652 = vmatmul.mubr.f32.gmra.mrb[2].mxu0 %v3546_v13  ;;  %2835 = vmatprep.subr.bf16.mxu1 %v2834_v12  ;;  %v2858_v7 = vpack.c.bf16 %v1977_v1, %v1976_v62  ;;  %v2882_v62 = vpack.c.bf16 %v1989_v57, %v1988_v56 }
  0x50   : > { %2993 = vmatpush3.bf16.msra.mxu0 %v2990_v2  ;;  %2654 = vmatprep.mubr.f32.mxu0 %v3565_v23  ;;  %v2096_v2 = vld [vmem:[%s3876_s1 + $0x400] sm:$0xff] }
  0x51   : > { %2995 = vmatprep.subr.bf16.mxu0 %v2994_v17  ;;  %2435 = vmatmul.mubr.f32.gmra.mrb[4].mxu1 %v3546_v13  ;;  %v3018_v9 = vpack.c.bf16 %v2097_v3, %v2096_v2  ;;  %v1990_v2 = vld [vmem:[%s3876_s1 + $0x1f0] sm:$0xff]  ;;  %v1991_v3 = vld [vmem:[%s3876_s1 + $0x1f8] sm:$0xff] }
  0x52   : > { %2837 = vmatpush3.bf16.msra.mxu1 %v2834_v12  ;;  %2437 = vmatprep.mubr.f32.mxu1 %v3565_v23  ;;  %v1979_v12 = vld [vmem:[%s3876_s1 + $0x198] sm:$0xff] }
  0x53   : > { %2655 = vmatmul.mubr.f32.gmra.mrb[4].mxu0 %v3568_v30  ;;  %2839 = vmatprep.subr.bf16.mxu1 %v2838_v27  ;;  %v2862_v20 = vpack.c.bf16 %v1979_v12, %v1978_v10  ;;  %v2000_v10 = vld [vmem:[%s3876_s1 + $0x200] sm:$0xff]  ;;  %v2001_v12 = vld [vmem:[%s3876_s1 + $0x208] sm:$0xff] }
  0x54   : > { %2997 = vmatpush3.bf16.msra.mxu0 %v2994_v17  ;;  %2657 = vmatprep.mubr.f32.mxu0 %v3587_v37  ;;  %v2098_v17 = vld [vmem:[%s3876_s1 + $0x410] sm:$0xff] }
  0x55   : > { %2999 = vmatprep.subr.bf16.mxu0 %v2998_v31  ;;  %2438 = vmatmul.mubr.f32.gmra.mrb[6].mxu1 %v3568_v30  ;;  %v3022_v21 = vpack.c.bf16 %v2099_v19, %v2098_v17  ;;  %v2890_v17 = vpack.c.bf16 %v2001_v12, %v2000_v10  ;;  %v2002_v19 = vld [vmem:[%s3876_s1 + $0x210] sm:$0xff] }
  0x56   : > { %2841 = vmatpush3.bf16.msra.mxu1 %v2838_v27  ;;  %2472 = vmatprep.mubr.f32.mxu1 %v613_v45  ;;  %v1981_v27 = vld [vmem:[%s3876_s1 + $0x1a8] sm:$0xff] }
  0x57   : > { %2658 = vmatmul.mubr.f32.gmra.mrb[6].mxu0 %v2047_v39  ;;  %2843 = vmatprep.subr.bf16.mxu1 %v2842_v38  ;;  %v2866_v33 = vpack.c.bf16 %v1981_v27, %v1980_v22  ;;  %v2103_v39 = vld [vmem:[%s3876_s1 + $0x438] sm:$0xff]  ;;  %v2105_v45 = vld [vmem:[%s3876_s1 + $0x448] sm:$0xff]  ;;  %v2004_v27 = vld [vmem:[%s3876_s1 + $0x220] sm:$0xff] }
  0x58   : > { %3001 = vmatpush3.bf16.msra.mxu0 %v2998_v31  ;;  %2692 = vmatprep.mubr.f32.mxu0 %v3385_v4  ;;  %v2100_v31 = vld [vmem:[%s3876_s1 + $0x420] sm:$0xff]  ;;  %v3034_v49 = vpack.c.bf16 %v2105_v45, %v2104_v44 }
  0x59   : > { %3003 = vmatprep.subr.bf16.mxu0 %v3002_v40  ;;  %v3026_v34 = vpack.c.bf16 %v2101_v32, %v2100_v31  ;;  %v2005_v31 = vld [vmem:[%s3876_s1 + $0x228] sm:$0xff] }
  0x5a   : > { %2845 = vmatpush3.bf16.msra.mxu1 %v2842_v38  ;;  %v2102_v38 = vld [vmem:[%s3876_s1 + $0x430] sm:$0xff]  ;;  %v2898_v32 = vpack.c.bf16 %v2005_v31, %v2004_v27 }
  0x5b   : > { %2847 = vmatprep.subr.bf16.mxu1 %v2846_v46  ;;  %v3030_v41 = vpack.c.bf16 %v2103_v39, %v2102_v38  ;;  %v1585_v38 = vld [vmem:[%s3795_s19 + $0x20] sm:$0xff]  ;;  %v2014_v39 = vld [vmem:[%s3876_s1 + $0x270] sm:$0xff] }
  0x5c   : > { %3005 = vmatpush3.bf16.msra.mxu0 %v3002_v40 }
  0x5d   : > { %3007 = vmatprep.subr.bf16.mxu0 %v3006_v47 }
  0x5e   : > { %2849 = vmatpush3.bf16.msra.mxu1 %v2846_v46  ;;  %v3701_v46 = vld [vmem:[%s3286_s16 + $0x81] sm:$0xff] }
  0x5f   : > { %2851 = vmatprep.subr.bf16.mxu1 %v2850_v52 }
  0x60   : > { %3009 = vmatpush3.bf16.msra.mxu0 %v3006_v47  ;;  %v2874_v47 = vpack.c.bf16 %v1985_v43, %v1984_v42  ;;  %v1587_v42 = vld [vmem:[%s3795_s19 + $0x30] sm:$0xff]  ;;  %v1588_v43 = vld [vmem:[%s3795_s19 + $0x38] sm:$0xff] }
  0x61   : > { %3011 = vmatprep.subr.bf16.mxu0 %v3010_v53 }
  0x62   : > { %2853 = vmatpush3.bf16.msra.mxu1 %v2850_v52  ;;  %v2106_v52 = vld [vmem:[%s3876_s1 + $0x450] sm:$0xff] }
  0x63   : > { %2855 = vmatprep.subr.bf16.mxu1 %v2854_v58 }
  0x64   : > { %3013 = vmatpush3.bf16.msra.mxu0 %v3010_v53  ;;  %v2107_v53 = vld [vmem:[%s3876_s1 + $0x458] sm:$0xff] }
  0x65   : > { %3015 = vmatprep.subr.bf16.mxu0 %v3014_v59  ;;  %v3038_v55 = vpack.c.bf16 %v2107_v53, %v2106_v52 }
  0x66   : > { %2857 = vmatpush3.bf16.msra.mxu1 %v2854_v58  ;;  %v2108_v58 = vld [vmem:[%s3876_s1 + $0x460] sm:$0xff] }
  0x67   : > { %2859 = vmatprep.subr.bf16.mxu1 %v2858_v7 }
  0x68   : > { %3017 = vmatpush3.bf16.msra.mxu0 %v3014_v59  ;;  %v2109_v59 = vld [vmem:[%s3876_s1 + $0x468] sm:$0xff] }
  0x69   : > { %3019 = vmatprep.subr.bf16.mxu0 %v3018_v9  ;;  %2473 = vmatmul.mubr.f32.vlgmr.msra.gmra.mrb[0].mxu1 %v3302_v29  ;;  %v1982_v29 = vld [vmem:[%s3876_s1 + $0x1b0] sm:$0xff]  ;;  %v3042_v1 = vpack.c.bf16 %v2109_v59, %v2108_v58 }
  0x6a   : > { %2861 = vmatpush3.bf16.msra.mxu1 %v2858_v7  ;;  %2475 = vmatprep.mubr.f32.mxu1 %v3369_v61  ;;  %v2870_v40 = vpack.c.bf16 %v1983_v35, %v1982_v29  ;;  %v2886_v7 = vpack.c.bf16 %v1991_v3, %v1990_v2  ;;  %v2012_v29 = vld [vmem:[%s3876_s1 + $0x260] sm:$0xff] }
  0x6b   : > { %2693 = vmatmul.mubr.f32.vlgmr.msra.gmra.mrb[0].mxu0 %v3392_v6  ;;  %2863 = vmatprep.subr.bf16.mxu1 %v2862_v20 }
  0x6c   : > { %3021 = vmatpush3.bf16.msra.mxu0 %v3018_v9  ;;  %2695 = vmatprep.mubr.f32.mxu0 %v3413_v14 }
  0x6d   : > { %3023 = vmatprep.subr.bf16.mxu0 %v3022_v21  ;;  %2476 = vmatmul.mubr.f32.gmra.mrb[2].mxu1 %v3389_v5 }
  0x6e   : > { %2865 = vmatpush3.bf16.msra.mxu1 %v2862_v20  ;;  %2478 = vmatprep.mubr.f32.mxu1 %v3395_v8  ;;  %v2003_v20 = vld [vmem:[%s3876_s1 + $0x218] sm:$0xff] }
  0x6f   : > { %2696 = vmatmul.mubr.f32.gmra.mrb[2].mxu0 %v3420_v16  ;;  %2867 = vmatprep.subr.bf16.mxu1 %v2866_v33  ;;  %v2894_v22 = vpack.c.bf16 %v2003_v20, %v2002_v19 }
  0x70   : > { %3025 = vmatpush3.bf16.msra.mxu0 %v3022_v21  ;;  %2698 = vmatprep.mubr.f32.mxu0 %v3441_v24  ;;  %v1589_v21 = vld [vmem:[%s3879_s4] sm:$0xf] }
  0x71   : > { %3027 = vmatprep.subr.bf16.mxu0 %v3026_v34  ;;  %2479 = vmatmul.mubr.f32.gmra.mrb[4].mxu1 %v3417_v15 }
  0x72   : > { %2869 = vmatpush3.bf16.msra.mxu1 %v2866_v33  ;;  %2481 = vmatprep.mubr.f32.mxu1 %v3423_v18  ;;  %v2006_v33 = vld [vmem:[%s3876_s1 + $0x230] sm:$0xff] }
  0x73   : > { %2699 = vmatmul.mubr.f32.gmra.mrb[4].mxu0 %v3448_v26  ;;  %2871 = vmatprep.subr.bf16.mxu1 %v2870_v40 }
  0x74   : > { %3029 = vmatpush3.bf16.msra.mxu0 %v3026_v34  ;;  %2701 = vmatprep.mubr.f32.mxu0 %v3701_v46  ;;  %v2007_v34 = vld [vmem:[%s3876_s1 + $0x238] sm:$0xff] }
  0x75   : > { %3031 = vmatprep.subr.bf16.mxu0 %v3030_v41  ;;  %2482 = vmatmul.mubr.f32.gmra.mrb[6].mxu1 %v3445_v25 }
  0x76   : > { %2873 = vmatpush3.bf16.msra.mxu1 %v2870_v40  ;;  %2516 = vmatprep.mubr.f32.mxu1 %v3523_v63  ;;  %v2111_v63 = vld [vmem:[%s3876_s1 + $0x478] sm:$0xff] }
  0x77   : > { %2702 = vmatmul.mubr.f32.gmra.mrb[6].mxu0 %v2071_v48  ;;  %2875 = vmatprep.subr.bf16.mxu1 %v2874_v47  ;;  %v2015_v40 = vld [vmem:[%s3876_s1 + $0x278] sm:$0xff] }
  0x78   : > { %3033 = vmatpush3.bf16.msra.mxu0 %v3030_v41  ;;  %2736 = vmatprep.mubr.f32.mxu0 %v3369_v61  ;;  %v2110_v61 = vld [vmem:[%s3876_s1 + $0x470] sm:$0xff]  ;;  %v2918_v41 = vpack.c.bf16 %v2015_v40, %v2014_v39 }
  0x79   : > { %3035 = vmatprep.subr.bf16.mxu0 %v3034_v49  ;;  %v3046_v9 = vpack.c.bf16 %v2111_v63, %v2110_v61 }
  0x7a   : > { %2877 = vmatpush3.bf16.msra.mxu1 %v2874_v47 }
  0x7b   : > { %2879 = vmatprep.subr.bf16.mxu1 %v2878_v54 }
  0x7c   : > { %3037 = vmatpush3.bf16.msra.mxu0 %v3034_v49 }
  0x7d   : > { %3039 = vmatprep.subr.bf16.mxu0 %v3038_v55 }
  0x7e   : > { %2881 = vmatpush3.bf16.msra.mxu1 %v2878_v54 }
  0x7f   : > { %2883 = vmatprep.subr.bf16.mxu1 %v2882_v62 }
  0x80   : > { %3041 = vmatpush3.bf16.msra.mxu0 %v3038_v55 }
  0x81   : > { %3043 = vmatprep.subr.bf16.mxu0 %v3042_v1 }
  0x82   : > { %2885 = vmatpush3.bf16.msra.mxu1 %v2882_v62 }
  0x83   : > { %2887 = vmatprep.subr.bf16.mxu1 %v2886_v7 }
  0x84   : > { %3045 = vmatpush3.bf16.msra.mxu0 %v3042_v1 }
  0x85   : > { %3047 = vmatprep.subr.bf16.mxu0 %v3046_v9 }
  0x86   : > { %2889 = vmatpush3.bf16.msra.mxu1 %v2886_v7 }
  0x87   : > { %2891 = vmatprep.subr.bf16.mxu1 %v2890_v17 }
  0x88   : > { %3049 = vmatpush3.bf16.msra.mxu0 %v3046_v9 }
  0x89   : > { %2748 = vmatprep.subr.msk.mxu0 %vm1615_vm0, %v1589_v21  ;;  %2517 = vmatmul.mubr.f32.vlgmr.msra.gmra.mrb[0].mxu1 %v3471_v36  ;;  %v2009_v36 = vld [vmem:[%s3876_s1 + $0x248] sm:$0xff] }
  0x8a   : > { %2893 = vmatpush3.bf16.msra.mxu1 %v2890_v17  ;;  %2519 = vmatprep.mubr.f32.mxu1 %v3526_v0  ;;  %v1581_v0 = vld [vmem:[%s3795_s19] sm:$0xff] }
  0x8b   : > { %2737 = vmatmul.mubr.f32.vlgmr.msra.gmra.mrb[0].mxu0 %v3389_v5  ;;  %2895 = vmatprep.subr.bf16.mxu1 %v2894_v22  ;;  %v2902_v5 = vpack.c.bf16 %v2007_v34, %v2006_v33 }
  0x8c   : > { %2739 = vmatprep.mubr.f32.mxu0 %v3395_v8  ;;  %2749 = vmatpush3.msk.msra.mxu0 %vm1615_vm0, %v1589_v21  ;;  %v2008_v8 = vld [vmem:[%s3876_s1 + $0x240] sm:$0xff] }
  0x8d   : > { %2520 = vmatmul.mubr.f32.gmra.mrb[2].mxu1 %v3543_v11  ;;  %v2010_v11 = vld [vmem:[%s3876_s1 + $0x250] sm:$0xff] }
  0x8e   : > { %2897 = vmatpush3.bf16.msra.mxu1 %v2894_v22  ;;  %2522 = vmatprep.mubr.f32.mxu1 %v3546_v13  ;;  %v2011_v13 = vld [vmem:[%s3876_s1 + $0x258] sm:$0xff] }
  0x8f   : > { %2740 = vmatmul.mubr.f32.gmra.mrb[2].mxu0 %v3417_v15  ;;  %2899 = vmatprep.subr.bf16.mxu1 %v2898_v32  ;;  %v2095_v15 = vld [vmem:[%s3286_s16 + $0x92] sm:$0xff] }
  0x90   : > { %2742 = vmatprep.mubr.f32.mxu0 %v3423_v18  ;;  %v2906_v18 = vpack.c.bf16 %v2009_v36, %v2008_v8 }
  0x91   : > { %2523 = vmatmul.mubr.f32.gmra.mrb[4].mxu1 %v3565_v23  ;;  %v1583_v23 = vld [vmem:[%s3795_s19 + $0x10] sm:$0xff] }
  0x92   : > { %2901 = vmatpush3.bf16.msra.mxu1 %v2898_v32  ;;  %2525 = vmatprep.mubr.f32.mxu1 %v3568_v30  ;;  %v2013_v30 = vld [vmem:[%s3876_s1 + $0x268] sm:$0xff] }
  0x93   : > { %2743 = vmatmul.mubr.f32.gmra.mrb[4].mxu0 %v3445_v25  ;;  %2903 = vmatprep.subr.bf16.mxu1 %v2902_v5  ;;  %v1582_v25 = vld [vmem:[%s3795_s19 + $0x8] sm:$0xff]  ;;  %v2914_v35 = vpack.c.bf16 %v2013_v30, %v2012_v29 }
  0x94   : > { %2745 = vmatprep.mubr.f32.mxu0 %v3451_v28  ;;  %v2910_v28 = vpack.c.bf16 %v2011_v13, %v2010_v11 }
  0x95   : > { %2526 = vmatmul.mubr.f32.gmra.mrb[6].mxu1 %v3587_v37  ;;  %v1584_v37 = vld [vmem:[%s3795_s19 + $0x18] sm:$0xff] }
  0x96   : > { %2905 = vmatpush3.bf16.msra.mxu1 %v2902_v5  ;;  %2560 = vmatprep.mubr.f32.mxu1 %v3366_v60  ;;  %v1586_v60 = vld [vmem:[%s3795_s19 + $0x28] sm:$0xff]  ;;  %s3856_s19 = scalar_lea.vmem %s3881_s6, %s2125_s11 }
  0x97   : > { %2746 = vmatmul.mubr.f32.gmra.mrb[6].mxu0 %v2095_v15  ;;  %2907 = vmatprep.subr.bf16.mxu1 %v2906_v18 }
  0x98   : > { %2750 = vmatprep.mubr.msk.f32.mxu0 %vm1590_vm1, %v1581_v0 }
  0x9a   : > { %2909 = vmatpush3.bf16.msra.mxu1 %v2906_v18 }
  0x9b   : > { %2751 = vmatmul.mubr.msk.f32.vlgmr.msra.gmra.mrb[0].mxu0 %vm1590_vm1, %v1582_v25  ;;  %2911 = vmatprep.subr.bf16.mxu1 %v2910_v28 }
  0x9c   : > { %2753 = vmatprep.mubr.msk.f32.mxu0 %vm1590_vm1, %v1583_v23 }
  0x9e   : > { %2913 = vmatpush3.bf16.msra.mxu1 %v2910_v28 }
  0x9f   : > { %2754 = vmatmul.mubr.msk.f32.gmra.mrb[2].mxu0 %vm1590_vm1, %v1584_v37  ;;  %2915 = vmatprep.subr.bf16.mxu1 %v2914_v35 }
  0xa0   : > { %2756 = vmatprep.mubr.msk.f32.mxu0 %vm1590_vm1, %v1585_v38 }
  0xa2   : > { %2917 = vmatpush3.bf16.msra.mxu1 %v2914_v35 }
  0xa3   : > { %2757 = vmatmul.mubr.msk.f32.gmra.mrb[4].mxu0 %vm1590_vm1, %v1586_v60  ;;  %2919 = vmatprep.subr.bf16.mxu1 %v2918_v41 }
  0xa4   : > { %2759 = vmatprep.mubr.msk.f32.mxu0 %vm1590_vm1, %v1587_v42 }
  0xa6   : > { %2921 = vmatpush3.bf16.msra.mxu1 %v2918_v41 }
  0xa7   : > { %2760 = vmatmul.mubr.msk.f32.gmra.mrb[6].mxu0 %vm1590_vm1, %v1588_v43 }
  0xa9   : > { %2561 = vmatmul.mubr.f32.vlgmr.msra.gmra.mrb[0].mxu1 %v3385_v4 }
  0xaa   : > { %2563 = vmatprep.mubr.f32.mxu1 %v3392_v6 }
  0xad   : > { %2564 = vmatmul.mubr.f32.gmra.mrb[2].mxu1 %v3413_v14  ;;  %v2121_v14 = vld [vmem:[%s3877_s2] ss:$0 sm:$0xff] }
  0xae   : > { %2566 = vmatprep.mubr.f32.mxu1 %v3420_v16 }
  0xb1   : > { %2567 = vmatmul.mubr.f32.gmra.mrb[4].mxu1 %v3441_v24 }
  0xb2   : > { %2569 = vmatprep.mubr.f32.mxu1 %v3448_v26  ;;  %v2122_v26 = vld [vmem:[%s3880_s5] ss:$0 sm:$0xff] }
  0xb5   : > { %2570 = vmatmul.mubr.f32.gmra.mrb[6].mxu1 %v3701_v46 }
 0x16e   : > { %v2752_v44 = vpop.f32.mrb[0].mxu0 }
 0x16f   : > { %v1685_v45 = vpop.f32.mrb[1].mxu0 }
 0x172   : > { %v2755_v47 = vpop.f32.mrb[2].mxu0 }
 0x173   : > { %v1695_v48 = vpop.f32.mrb[3].mxu0 }
 0x176   : > { %v2758_v49 = vpop.f32.mrb[4].mxu0 }
 0x177   : > { %v1705_v50 = vpop.f32.mrb[5].mxu0 }
 0x17a   : > { %v2761_v4 = vpop.f32.mrb[6].mxu0 }
 0x17b   : > { %v1715_v51 = vpop.f32.mrb[7].mxu0 }
 0x17c   : > { %v2562_v6 = vpop.f32.mrb[0].mxu1 }
 0x17d   : > { %v3050_v16 = vadd.f32 %v2752_v44, %v2562_v6  ;;  %v981_v24 = vpop.f32.mrb[1].mxu1 }
 0x17e   : > { %v3052_v46 = vadd.f32 %v1685_v45, %v981_v24 }
 0x17f   : > { %v3051_v52 = vadd.f32 %v3050_v16, %v2121_v14 }
 0x180   : > { %v3053_v53 = vadd.f32 %v3052_v46, %v2121_v14  ;;  %v2565_v54 = vpop.f32.mrb[2].mxu1 }
 0x181   : > { %v1755_v55 = vadd.f32 %v3051_v52, %v2122_v26  ;;  %v3054_v56 = vadd.f32 %v2755_v47, %v2565_v54  ;;  %v991_v57 = vpop.f32.mrb[3].mxu1 }
 0x182   : > { %v1754_v58 = vadd.f32 %v3053_v53, %v2122_v26  ;;  %v3056_v59 = vadd.f32 %v1695_v48, %v991_v57 }
 0x183   : > { %v1763_v62 = vmax.f32 %v1755_v55, 0.0  ;;  %v3055_v1 = vadd.f32 %v3054_v56, %v2121_v14 }
 0x184   : > { %v1762_v2 = vmax.f32 %v1754_v58, 0.0  ;;  %v3057_v3 = vadd.f32 %v3056_v59, %v2121_v14  ;;  %v2568_v61 = vpop.f32.mrb[4].mxu1 }
 0x185   : > { %1771 = vst [vmem:[%s3856_s19 + $0x8] sm:$0xff] %v1763_v62  ;;  %v1757_v63 = vadd.f32 %v3055_v1, %v2122_v26  ;;  %v3058_v7 = vadd.f32 %v2758_v49, %v2568_v61  ;;  %v1001_v9 = vpop.f32.mrb[5].mxu1 }
 0x186   : > { %1770 = vst [vmem:[%s3856_s19] sm:$0xff] %v1762_v2  ;;  %v1756_v10 = vadd.f32 %v3057_v3, %v2122_v26  ;;  %v3060_v12 = vadd.f32 %v1705_v50, %v1001_v9 }
 0x187   : > { %v1765_v17 = vmax.f32 %v1757_v63, 0.0  ;;  %v3059_v19 = vadd.f32 %v3058_v7, %v2121_v14 }
 0x188   : > { %v1764_v20 = vmax.f32 %v1756_v10, 0.0  ;;  %v3061_v21 = vadd.f32 %v3060_v12, %v2121_v14  ;;  %v2571_v22 = vpop.f32.mrb[6].mxu1 }
 0x189   : > { %1773 = vst [vmem:[%s3856_s19 + $0x18] sm:$0xff] %v1765_v17  ;;  %v1759_v27 = vadd.f32 %v3059_v19, %v2122_v26  ;;  %v3062_v31 = vadd.f32 %v2761_v4, %v2571_v22  ;;  %v1011_v32 = vpop.f32.mrb[7].mxu1 }
 0x18a   : > { %1772 = vst [vmem:[%s3856_s19 + $0x10] sm:$0xff] %v1764_v20  ;;  %v1758_v33 = vadd.f32 %v3061_v21, %v2122_v26  ;;  %v3064_v34 = vadd.f32 %v1715_v51, %v1011_v32 }
 0x18b   : > { %v1767_v5 = vmax.f32 %v1759_v27, 0.0  ;;  %v3063_v8 = vadd.f32 %v3062_v31, %v2121_v14 }
 0x18c   : > { %v1766_v36 = vmax.f32 %v1758_v33, 0.0  ;;  %v3065_v15 = vadd.f32 %v3064_v34, %v2121_v14 }
 0x18d   : > { %1775 = vst [vmem:[%s3856_s19 + $0x28] sm:$0xff] %v1767_v5  ;;  %v1761_v18 = vadd.f32 %v3063_v8, %v2122_v26 }
 0x18e   : > { %1774 = vst [vmem:[%s3856_s19 + $0x20] sm:$0xff] %v1766_v36  ;;  %v1760_v0 = vadd.f32 %v3065_v15, %v2122_v26 }
 0x18f   : > { %v1769_v11 = vmax.f32 %v1761_v18, 0.0 }
 0x190   : > { %v1768_v13 = vmax.f32 %v1760_v0, 0.0 }
 0x191   : > { %1777 = vst [vmem:[%s3856_s19 + $0x38] sm:$0xff] %v1769_v11 }
 0x192   : > { %1776 = vst [vmem:[%s3856_s19 + $0x30] sm:$0xff] %v1768_v13 }
 0x193 PF: > { %s16_s23 = sadd.s32 1, %s3177_s23   ;;  %s3882_s21 = smov %s3173_s22 }
 0x194   : > { %p13_p5 = scmp.ge.s32.totalorder %s16_s23, 4   ;;  %s3883_s22 = smov %s3885_s24 }
 0x196   :  { %15 = sbr.rel (!%p13_p5) target bundleno = 2 (0x2), region = 99 }

</bundles_post_ra>
